<compile_context>
chip_gen: v5e
topology: v5e:2x2
jax: 0.10.0
libtpu: 0.0.40
codegen_flags: <defaults>
</compile_context>

<pallas_src>
import jax
import jax.numpy as jnp
from jax.experimental import pallas as pl
from jax.experimental.pallas import tpu as pltpu


def single_prop_kernel(dest_ref, se_ref,
                       w1d_ref, w1se_ref, b1_ref, w2_ref, b2k_ref,
                       wih_ref, whh_ref, bih_ref, bhh_ref,
                       out_ref):
    """Feature-major layout: activations are [feature, node]; node axis is the lane axis."""
    f32 = jnp.float32
    dest = dest_ref[...]                                   # [Dn, TN]   destination features h_v
    K = se_ref.shape[0]
    Dn = dest.shape[0]

    # ---- MLP layer 1, concat-free. Dest contribution (incl. bias) computed once per node;
    #      b1 broadcast along lanes happens exactly once here (not per k).
    h_dest = jnp.dot(w1d_ref[...], dest, preferred_element_type=f32) + b1_ref[...]   # [H, TN]

    # Static unrolled K loop over 2-D slabs; ReLU then accumulate the neighbor sum.
    hsum = None
    for k in range(K):
        se_k = se_ref[k]                                   # [Dn+De, TN]  src||edge features
        h_k = jnp.maximum(
            jnp.dot(w1se_ref[...], se_k, preferred_element_type=f32) + h_dest, 0.0)  # [H, TN]
        hsum = h_k if hsum is None else hsum + h_k

    # ---- MLP layer 2 after the (linear) neighbor sum: sum_K(W2 h + b2) == W2 (sum_K h) + K*b2.
    a = jnp.dot(w2_ref[...], hsum, preferred_element_type=f32) + b2k_ref[...]        # [Dact, TN]

    # ---- node_update_func: torch.nn.GRUCell(a, dest). Two fused gate matmuls; gate slices are
    #      tile-aligned 8-sublane slices (offsets 0/Dn/2Dn along the sublane axis).
    gi = jnp.dot(wih_ref[...], a, preferred_element_type=f32) + bih_ref[...]         # [3Dn, TN]
    gh = jnp.dot(whh_ref[...], dest, preferred_element_type=f32) + bhh_ref[...]      # [3Dn, TN]
    r = jax.nn.sigmoid(gi[:Dn] + gh[:Dn])
    z = jax.nn.sigmoid(gi[Dn:2 * Dn] + gh[Dn:2 * Dn])
    n = jnp.tanh(gi[2 * Dn:] + r * gh[2 * Dn:])
    out_ref[...] = ((1.0 - z) * n + z * dest).astype(out_ref.dtype)                  # [Dn, TN]


def single_prop_forward(node_feat, src_idx, edge_feat, params, *, tile_n=512):
    """node_feat: [N, Dn] f32; src_idx: [N, K] int32; edge_feat: [N, K, De] f32."""
    N, Dn = node_feat.shape
    K = src_idx.shape[1]
    De = edge_feat.shape[-1]
    (w1, b1, w2, b2, wih, whh, bih, bhh) = params
    Din, H = w1.shape
    Dact = w2.shape[1]
    assert Din == 2 * Dn + De
    tile_n = min(tile_n, N)
    assert N % tile_n == 0, "pad N up to a multiple of tile_n"
    assert tile_n % 128 == 0, "node tile must be lane-aligned"
    assert Dn % 8 == 0, "node feature dim must be sublane-aligned"

    f32 = jnp.float32
    Dse = Dn + De

    # Feature-major (transposed) parameter layout; layer-1 src/edge weights fused.
    w1d_t = jnp.asarray(w1[:Dn].T, f32)              # [H, Dn]     dest part of W1
    w1se_t = jnp.asarray(w1[Dn:].T, f32)             # [H, Dn+De]  src||edge part of W1
    b1_t = jnp.asarray(b1.T, f32)                    # [H, 1]
    w2_t = jnp.asarray(w2.T, f32)                    # [Dact, H]
    b2k_t = jnp.asarray((K * b2).T, f32)             # [Dact, 1]   neighbor-summed 2nd-layer bias
    wih_t = jnp.asarray(wih.T, f32)                  # [3Dn, Dact]
    whh_t = jnp.asarray(whh.T, f32)                  # [3Dn, Dn]
    bih_t = jnp.asarray(bih.T, f32)                  # [3Dn, 1]
    bhh_t = jnp.asarray(bhh.T, f32)                  # [3Dn, 1]

    # TODO(synk): fuse this data-dependent gather into the kernel (scalar-prefetch src_idx).
    src_feat = node_feat[src_idx]                                     # [N, K, Dn]
    se = jnp.concatenate([src_feat, edge_feat], axis=-1)              # [N, K, Dn+De]
    se_t = jnp.transpose(se, (1, 2, 0)).astype(f32)                   # [K, Dn+De, N]  K-major
    dest_t = jnp.transpose(node_feat).astype(f32)                     # [Dn, N]

    full = lambda i: (0, 0)
    grid = (N // tile_n,)

    out_t = pl.pallas_call(
        single_prop_kernel,
        out_shape=jax.ShapeDtypeStruct((Dn, N), f32),
        grid_spec=pltpu.PrefetchScalarGridSpec(
            num_scalar_prefetch=0,
            grid=grid,
            in_specs=[
                pl.BlockSpec((Dn, tile_n), lambda i: (0, i)),          # dest features [Dn, TN]
                pl.BlockSpec((K, Dse, tile_n), lambda i: (0, 0, i)),   # src||edge [K, Dn+De, TN]
                # Weights/biases: constant index_maps -> fetched into VMEM once.
                pl.BlockSpec((H, Dn), full),                           # W1 dest part
                pl.BlockSpec((H, Dse), full),                          # W1 src||edge part
                pl.BlockSpec((H, 1), full),                            # b1
                pl.BlockSpec((Dact, H), full),                         # W2
                pl.BlockSpec((Dact, 1), full),                         # K * b2
                pl.BlockSpec((3 * Dn, Dact), full),                    # W_ih (gates stacked)
                pl.BlockSpec((3 * Dn, Dn), full),                      # W_hh (gates stacked)
                pl.BlockSpec((3 * Dn, 1), full),                       # b_ih
                pl.BlockSpec((3 * Dn, 1), full),                       # b_hh
            ],
            out_specs=pl.BlockSpec((Dn, tile_n), lambda i: (0, i)),    # h' [Dn, TN], lane-dense
        ),
        compiler_params=pltpu.CompilerParams(
            dimension_semantics=("parallel",)),
    )(dest_t, se_t, w1d_t, w1se_t, b1_t, w2_t, b2k_t, wih_t, whh_t, bih_t, bhh_t)
    return jnp.transpose(out_t)                                        # [N, Dn]


def single_prop_reference(node_feat, src_idx, edge_feat, params):
    """Pure-JAX f32 reference matching the original PyTorch module math exactly."""
    (w1, b1, w2, b2, wih, whh, bih, bhh) = params
    N, Dn = node_feat.shape
    K = src_idx.shape[1]
    src_feat = node_feat[src_idx]
    dest_b = jnp.broadcast_to(node_feat[:, None, :], (N, K, Dn))
    msg = jnp.concatenate([dest_b, src_feat, edge_feat], axis=-1)
    h = jnp.maximum(msg @ w1 + b1[0], 0.0)          # MLP layer 1 (Linear -> ReLU)
    m_out = h @ w2 + b2[0]                          # MLP layer 2 (Linear)
    a = m_out.sum(axis=1)                           # neighbor sum
    gi = a @ wih + bih[0]
    gh = node_feat @ whh + bhh[0]
    i_r, i_z, i_n = gi[:, :Dn], gi[:, Dn:2 * Dn], gi[:, 2 * Dn:]
    h_r, h_z, h_n = gh[:, :Dn], gh[:, Dn:2 * Dn], gh[:, 2 * Dn:]
    r = jax.nn.sigmoid(i_r + h_r)
    z = jax.nn.sigmoid(i_z + h_z)
    n = jnp.tanh(i_n + r * h_n)
    return (1.0 - z) * n + z * node_feat


if __name__ == "__main__":
    # Module hyper-parameters (SingleProp defaults; MLP num_layers=2).
    num_auxiliary = 2
    node_emb_dim = 8
    edge_emb_dim = node_emb_dim
    hidden_dim = 2 * (node_emb_dim * 2 + edge_emb_dim + num_auxiliary)   # 52
    activation_dim = node_emb_dim
    Din = node_emb_dim * 2 + edge_emb_dim + num_auxiliary                # 26
    De = edge_emb_dim + num_auxiliary                                    # 10

    # N=1024 with tile_n=512 -> 2 "parallel" grid steps (both v7x TensorCores busy); on
    # single-core v5e/v6e, tile_n=N is also fine.
    N, K = 1024, 4

    key = jax.random.PRNGKey(0)
    keys = jax.random.split(key, 12)

    node_feat = jax.random.normal(keys[0], (N, node_emb_dim), jnp.float32)
    src_idx = jax.random.randint(keys[1], (N, K), 0, N, jnp.int32)
    edge_feat = jax.random.normal(keys[2], (N, K, De), jnp.float32)

    # Deterministic parameter init (stored [in, out]); biases as [1, out].
    scale = 0.1
    w1 = scale * jax.random.normal(keys[3], (Din, hidden_dim), jnp.float32)
    b1 = scale * jax.random.normal(keys[4], (1, hidden_dim), jnp.float32)
    w2 = scale * jax.random.normal(keys[5], (hidden_dim, activation_dim), jnp.float32)
    b2 = scale * jax.random.normal(keys[6], (1, activation_dim), jnp.float32)
    wih = scale * jax.random.normal(keys[7], (activation_dim, 3 * node_emb_dim), jnp.float32)
    whh = scale * jax.random.normal(keys[8], (node_emb_dim, 3 * node_emb_dim), jnp.float32)
    bih = scale * jax.random.normal(keys[9], (1, 3 * node_emb_dim), jnp.float32)
    bhh = scale * jax.random.normal(keys[10], (1, 3 * node_emb_dim), jnp.float32)
    params = (w1, b1, w2, b2, wih, whh, bih, bhh)

    ref = single_prop_reference(node_feat, src_idx, edge_feat, params)

    out = single_prop_forward(node_feat, src_idx, edge_feat, params, tile_n=512)
    out = jax.block_until_ready(out)
    assert out.shape == (N, node_emb_dim)
    assert jnp.allclose(out, ref, atol=1e-4, rtol=1e-4), "Pallas kernel mismatch vs reference"

    print("KERNEL_OK")
</pallas_src>

<mosaic_0001>
module attributes {stable_mosaic.version = 11 : i64} {
  func.func @single_prop_kernel(%arg0: i32, %arg1: memref<8x512xf32, #tpu.memory_space<vmem>>, %arg2: memref<4x18x512xf32, #tpu.memory_space<vmem>>, %arg3: memref<52x8xf32, #tpu.memory_space<vmem>>, %arg4: memref<52x18xf32, #tpu.memory_space<vmem>>, %arg5: memref<52x1xf32, #tpu.memory_space<vmem>>, %arg6: memref<8x52xf32, #tpu.memory_space<vmem>>, %arg7: memref<8x1xf32, #tpu.memory_space<vmem>>, %arg8: memref<24x8xf32, #tpu.memory_space<vmem>>, %arg9: memref<24x8xf32, #tpu.memory_space<vmem>>, %arg10: memref<24x1xf32, #tpu.memory_space<vmem>>, %arg11: memref<24x1xf32, #tpu.memory_space<vmem>>, %arg12: memref<8x512xf32, #tpu.memory_space<vmem>>) attributes {dimension_semantics = [#tpu.dimension_semantics<parallel>], iteration_bounds = array<i64: 2>, scalar_prefetch = 0 : i64, scratch_operands = 0 : i64, tpu.core_type = #tpu.core_type<tc>, window_params = [{transform_indices = @transform_0, window_bounds = array<i64: 8, 512>}, {transform_indices = @transform_1, window_bounds = array<i64: 4, 18, 512>}, {pipeline_mode = #tpu.pipeline_mode<synchronous>, transform_indices = @transform_2, window_bounds = array<i64: 52, 8>}, {pipeline_mode = #tpu.pipeline_mode<synchronous>, transform_indices = @transform_3, window_bounds = array<i64: 52, 18>}, {pipeline_mode = #tpu.pipeline_mode<synchronous>, transform_indices = @transform_4, window_bounds = array<i64: 52, 1>}, {pipeline_mode = #tpu.pipeline_mode<synchronous>, transform_indices = @transform_5, window_bounds = array<i64: 8, 52>}, {pipeline_mode = #tpu.pipeline_mode<synchronous>, transform_indices = @transform_6, window_bounds = array<i64: 8, 1>}, {pipeline_mode = #tpu.pipeline_mode<synchronous>, transform_indices = @transform_7, window_bounds = array<i64: 24, 8>}, {pipeline_mode = #tpu.pipeline_mode<synchronous>, transform_indices = @transform_8, window_bounds = array<i64: 24, 8>}, {pipeline_mode = #tpu.pipeline_mode<synchronous>, transform_indices = @transform_9, window_bounds = array<i64: 24, 1>}, {pipeline_mode = #tpu.pipeline_mode<synchronous>, transform_indices = @transform_10, window_bounds = array<i64: 24, 1>}, {transform_indices = @transform_11, window_bounds = array<i64: 8, 512>}]} {
    %c0 = arith.constant 0 : index
    %c0_0 = arith.constant 0 : index
    %0 = vector.load %arg1[%c0, %c0_0] : memref<8x512xf32, #tpu.memory_space<vmem>>, vector<8x512xf32>
    %c0_1 = arith.constant 0 : index
    %c0_2 = arith.constant 0 : index
    %1 = vector.load %arg3[%c0_1, %c0_2] : memref<52x8xf32, #tpu.memory_space<vmem>>, vector<52x8xf32>
    %cst = arith.constant dense<0.000000e+00> : vector<52x512xf32>
    %2 = tpu.matmul %1, %0, %cst {dimension_numbers = #tpu.dot_dimension_numbers<[1], [0], [0], [1], [0, 0, 1, 1], [], []>} : vector<52x8xf32>, vector<8x512xf32>, vector<52x512xf32> -> vector<52x512xf32>
    %c0_3 = arith.constant 0 : index
    %c0_4 = arith.constant 0 : index
    %3 = vector.load %arg5[%c0_3, %c0_4] : memref<52x1xf32, #tpu.memory_space<vmem>>, vector<52x1xf32>
    %4 = vector.broadcast %3 : vector<52x1xf32> to vector<52x512xf32>
    %5 = arith.addf %2, %4 : vector<52x512xf32>
    %c0_5 = arith.constant 0 : index
    %c0_6 = arith.constant 0 : index
    %c0_7 = arith.constant 0 : index
    %6 = vector.load %arg2[%c0_5, %c0_6, %c0_7] : memref<4x18x512xf32, #tpu.memory_space<vmem>>, vector<1x18x512xf32>
    %7 = vector.shape_cast %6 : vector<1x18x512xf32> to vector<18x512xf32>
    %c0_8 = arith.constant 0 : index
    %c0_9 = arith.constant 0 : index
    %8 = vector.load %arg4[%c0_8, %c0_9] : memref<52x18xf32, #tpu.memory_space<vmem>>, vector<52x18xf32>
    %cst_10 = arith.constant dense<0.000000e+00> : vector<52x512xf32>
    %9 = tpu.matmul %8, %7, %cst_10 {dimension_numbers = #tpu.dot_dimension_numbers<[1], [0], [0], [1], [0, 0, 1, 1], [], []>} : vector<52x18xf32>, vector<18x512xf32>, vector<52x512xf32> -> vector<52x512xf32>
    %10 = arith.addf %9, %5 : vector<52x512xf32>
    %cst_11 = arith.constant 0.000000e+00 : f32
    %11 = vector.broadcast %cst_11 : f32 to vector<52x512xf32>
    %12 = arith.maximumf %10, %11 : vector<52x512xf32>
    %c1 = arith.constant 1 : index
    %c0_12 = arith.constant 0 : index
    %c0_13 = arith.constant 0 : index
    %13 = vector.load %arg2[%c1, %c0_12, %c0_13] : memref<4x18x512xf32, #tpu.memory_space<vmem>>, vector<1x18x512xf32>
    %14 = vector.shape_cast %13 : vector<1x18x512xf32> to vector<18x512xf32>
    %c0_14 = arith.constant 0 : index
    %c0_15 = arith.constant 0 : index
    %15 = vector.load %arg4[%c0_14, %c0_15] : memref<52x18xf32, #tpu.memory_space<vmem>>, vector<52x18xf32>
    %cst_16 = arith.constant dense<0.000000e+00> : vector<52x512xf32>
    %16 = tpu.matmul %15, %14, %cst_16 {dimension_numbers = #tpu.dot_dimension_numbers<[1], [0], [0], [1], [0, 0, 1, 1], [], []>} : vector<52x18xf32>, vector<18x512xf32>, vector<52x512xf32> -> vector<52x512xf32>
    %17 = arith.addf %16, %5 : vector<52x512xf32>
    %cst_17 = arith.constant 0.000000e+00 : f32
    %18 = vector.broadcast %cst_17 : f32 to vector<52x512xf32>
    %19 = arith.maximumf %17, %18 : vector<52x512xf32>
    %20 = arith.addf %12, %19 : vector<52x512xf32>
    %c2 = arith.constant 2 : index
    %c0_18 = arith.constant 0 : index
    %c0_19 = arith.constant 0 : index
    %21 = vector.load %arg2[%c2, %c0_18, %c0_19] : memref<4x18x512xf32, #tpu.memory_space<vmem>>, vector<1x18x512xf32>
    %22 = vector.shape_cast %21 : vector<1x18x512xf32> to vector<18x512xf32>
    %c0_20 = arith.constant 0 : index
    %c0_21 = arith.constant 0 : index
    %23 = vector.load %arg4[%c0_20, %c0_21] : memref<52x18xf32, #tpu.memory_space<vmem>>, vector<52x18xf32>
    %cst_22 = arith.constant dense<0.000000e+00> : vector<52x512xf32>
    %24 = tpu.matmul %23, %22, %cst_22 {dimension_numbers = #tpu.dot_dimension_numbers<[1], [0], [0], [1], [0, 0, 1, 1], [], []>} : vector<52x18xf32>, vector<18x512xf32>, vector<52x512xf32> -> vector<52x512xf32>
    %25 = arith.addf %24, %5 : vector<52x512xf32>
    %cst_23 = arith.constant 0.000000e+00 : f32
    %26 = vector.broadcast %cst_23 : f32 to vector<52x512xf32>
    %27 = arith.maximumf %25, %26 : vector<52x512xf32>
    %28 = arith.addf %20, %27 : vector<52x512xf32>
    %c3 = arith.constant 3 : index
    %c0_24 = arith.constant 0 : index
    %c0_25 = arith.constant 0 : index
    %29 = vector.load %arg2[%c3, %c0_24, %c0_25] : memref<4x18x512xf32, #tpu.memory_space<vmem>>, vector<1x18x512xf32>
    %30 = vector.shape_cast %29 : vector<1x18x512xf32> to vector<18x512xf32>
    %c0_26 = arith.constant 0 : index
    %c0_27 = arith.constant 0 : index
    %31 = vector.load %arg4[%c0_26, %c0_27] : memref<52x18xf32, #tpu.memory_space<vmem>>, vector<52x18xf32>
    %cst_28 = arith.constant dense<0.000000e+00> : vector<52x512xf32>
    %32 = tpu.matmul %31, %30, %cst_28 {dimension_numbers = #tpu.dot_dimension_numbers<[1], [0], [0], [1], [0, 0, 1, 1], [], []>} : vector<52x18xf32>, vector<18x512xf32>, vector<52x512xf32> -> vector<52x512xf32>
    %33 = arith.addf %32, %5 : vector<52x512xf32>
    %cst_29 = arith.constant 0.000000e+00 : f32
    %34 = vector.broadcast %cst_29 : f32 to vector<52x512xf32>
    %35 = arith.maximumf %33, %34 : vector<52x512xf32>
    %36 = arith.addf %28, %35 : vector<52x512xf32>
    %c0_30 = arith.constant 0 : index
    %c0_31 = arith.constant 0 : index
    %37 = vector.load %arg6[%c0_30, %c0_31] : memref<8x52xf32, #tpu.memory_space<vmem>>, vector<8x52xf32>
    %cst_32 = arith.constant dense<0.000000e+00> : vector<8x512xf32>
    %38 = tpu.matmul %37, %36, %cst_32 {dimension_numbers = #tpu.dot_dimension_numbers<[1], [0], [0], [1], [0, 0, 1, 1], [], []>} : vector<8x52xf32>, vector<52x512xf32>, vector<8x512xf32> -> vector<8x512xf32>
    %c0_33 = arith.constant 0 : index
    %c0_34 = arith.constant 0 : index
    %39 = vector.load %arg7[%c0_33, %c0_34] : memref<8x1xf32, #tpu.memory_space<vmem>>, vector<8x1xf32>
    %40 = vector.broadcast %39 : vector<8x1xf32> to vector<8x512xf32>
    %41 = arith.addf %38, %40 : vector<8x512xf32>
    %c0_35 = arith.constant 0 : index
    %c0_36 = arith.constant 0 : index
    %42 = vector.load %arg8[%c0_35, %c0_36] : memref<24x8xf32, #tpu.memory_space<vmem>>, vector<24x8xf32>
    %cst_37 = arith.constant dense<0.000000e+00> : vector<24x512xf32>
    %43 = tpu.matmul %42, %41, %cst_37 {dimension_numbers = #tpu.dot_dimension_numbers<[1], [0], [0], [1], [0, 0, 1, 1], [], []>} : vector<24x8xf32>, vector<8x512xf32>, vector<24x512xf32> -> vector<24x512xf32>
    %c0_38 = arith.constant 0 : index
    %c0_39 = arith.constant 0 : index
    %44 = vector.load %arg10[%c0_38, %c0_39] : memref<24x1xf32, #tpu.memory_space<vmem>>, vector<24x1xf32>
    %45 = vector.broadcast %44 : vector<24x1xf32> to vector<24x512xf32>
    %46 = arith.addf %43, %45 : vector<24x512xf32>
    %c0_40 = arith.constant 0 : index
    %c0_41 = arith.constant 0 : index
    %47 = vector.load %arg9[%c0_40, %c0_41] : memref<24x8xf32, #tpu.memory_space<vmem>>, vector<24x8xf32>
    %cst_42 = arith.constant dense<0.000000e+00> : vector<24x512xf32>
    %48 = tpu.matmul %47, %0, %cst_42 {dimension_numbers = #tpu.dot_dimension_numbers<[1], [0], [0], [1], [0, 0, 1, 1], [], []>} : vector<24x8xf32>, vector<8x512xf32>, vector<24x512xf32> -> vector<24x512xf32>
    %c0_43 = arith.constant 0 : index
    %c0_44 = arith.constant 0 : index
    %49 = vector.load %arg11[%c0_43, %c0_44] : memref<24x1xf32, #tpu.memory_space<vmem>>, vector<24x1xf32>
    %50 = vector.broadcast %49 : vector<24x1xf32> to vector<24x512xf32>
    %51 = arith.addf %48, %50 : vector<24x512xf32>
    %52 = vector.extract_strided_slice %46 {offsets = [0, 0], sizes = [8, 512], strides = [1, 1]} : vector<24x512xf32> to vector<8x512xf32>
    %53 = vector.extract_strided_slice %51 {offsets = [0, 0], sizes = [8, 512], strides = [1, 1]} : vector<24x512xf32> to vector<8x512xf32>
    %54 = arith.addf %52, %53 : vector<8x512xf32>
    %55 = arith.negf %54 : vector<8x512xf32>
    %56 = math.exp %55 : vector<8x512xf32>
    %cst_45 = arith.constant 1.000000e+00 : f32
    %57 = vector.broadcast %cst_45 : f32 to vector<8x512xf32>
    %58 = arith.addf %57, %56 : vector<8x512xf32>
    %59 = arith.divf %57, %58 : vector<8x512xf32>
    %60 = vector.extract_strided_slice %46 {offsets = [8, 0], sizes = [8, 512], strides = [1, 1]} : vector<24x512xf32> to vector<8x512xf32>
    %61 = vector.extract_strided_slice %51 {offsets = [8, 0], sizes = [8, 512], strides = [1, 1]} : vector<24x512xf32> to vector<8x512xf32>
    %62 = arith.addf %60, %61 : vector<8x512xf32>
    %63 = arith.negf %62 : vector<8x512xf32>
    %64 = math.exp %63 : vector<8x512xf32>
    %cst_46 = arith.constant 1.000000e+00 : f32
    %65 = vector.broadcast %cst_46 : f32 to vector<8x512xf32>
    %66 = arith.addf %65, %64 : vector<8x512xf32>
    %67 = arith.divf %65, %66 : vector<8x512xf32>
    %68 = vector.extract_strided_slice %46 {offsets = [16, 0], sizes = [8, 512], strides = [1, 1]} : vector<24x512xf32> to vector<8x512xf32>
    %69 = vector.extract_strided_slice %51 {offsets = [16, 0], sizes = [8, 512], strides = [1, 1]} : vector<24x512xf32> to vector<8x512xf32>
    %70 = arith.mulf %59, %69 : vector<8x512xf32>
    %71 = arith.addf %68, %70 : vector<8x512xf32>
    %72 = math.tanh %71 : vector<8x512xf32>
    %cst_47 = arith.constant 1.000000e+00 : f32
    %73 = vector.broadcast %cst_47 : f32 to vector<8x512xf32>
    %74 = arith.subf %73, %67 : vector<8x512xf32>
    %75 = arith.mulf %74, %72 : vector<8x512xf32>
    %76 = arith.mulf %67, %0 : vector<8x512xf32>
    %77 = arith.addf %75, %76 : vector<8x512xf32>
    %c0_48 = arith.constant 0 : index
    %c0_49 = arith.constant 0 : index
    %78 = vector.load %arg12[%c0_48, %c0_49] : memref<8x512xf32, #tpu.memory_space<vmem>>, vector<8x512xf32>
    tpu.vector_store %arg12[%c0_48, %c0_49], %77 {strides = array<i32>} : memref<8x512xf32, #tpu.memory_space<vmem>>, vector<8x512xf32>,
    return
  }
  func.func @transform_0(%arg0: i32) -> (i32, i32) {
    %c0_i32 = arith.constant 0 : i32
    %c0_i32_0 = arith.constant 0 : i32
    return %c0_i32, %arg0 : i32, i32
  }
  func.func @transform_1(%arg0: i32) -> (i32, i32, i32) {
    %c0_i32 = arith.constant 0 : i32
    %c0_i32_0 = arith.constant 0 : i32
    %c0_i32_1 = arith.constant 0 : i32
    return %c0_i32, %c0_i32_0, %arg0 : i32, i32, i32
  }
  func.func @transform_2(%arg0: i32) -> (i32, i32) {
    %c0_i32 = arith.constant 0 : i32
    %c0_i32_0 = arith.constant 0 : i32
    %c0_i32_1 = arith.constant 0 : i32
    return %c0_i32, %c0_i32_0 : i32, i32
  }
  func.func @transform_3(%arg0: i32) -> (i32, i32) {
    %c0_i32 = arith.constant 0 : i32
    %c0_i32_0 = arith.constant 0 : i32
    %c0_i32_1 = arith.constant 0 : i32
    return %c0_i32, %c0_i32_0 : i32, i32
  }
  func.func @transform_4(%arg0: i32) -> (i32, i32) {
    %c0_i32 = arith.constant 0 : i32
    %c0_i32_0 = arith.constant 0 : i32
    %c0_i32_1 = arith.constant 0 : i32
    return %c0_i32, %c0_i32_0 : i32, i32
  }
  func.func @transform_5(%arg0: i32) -> (i32, i32) {
    %c0_i32 = arith.constant 0 : i32
    %c0_i32_0 = arith.constant 0 : i32
    %c0_i32_1 = arith.constant 0 : i32
    return %c0_i32, %c0_i32_0 : i32, i32
  }
  func.func @transform_6(%arg0: i32) -> (i32, i32) {
    %c0_i32 = arith.constant 0 : i32
    %c0_i32_0 = arith.constant 0 : i32
    %c0_i32_1 = arith.constant 0 : i32
    return %c0_i32, %c0_i32_0 : i32, i32
  }
  func.func @transform_7(%arg0: i32) -> (i32, i32) {
    %c0_i32 = arith.constant 0 : i32
    %c0_i32_0 = arith.constant 0 : i32
    %c0_i32_1 = arith.constant 0 : i32
    return %c0_i32, %c0_i32_0 : i32, i32
  }
  func.func @transform_8(%arg0: i32) -> (i32, i32) {
    %c0_i32 = arith.constant 0 : i32
    %c0_i32_0 = arith.constant 0 : i32
    %c0_i32_1 = arith.constant 0 : i32
    return %c0_i32, %c0_i32_0 : i32, i32
  }
  func.func @transform_9(%arg0: i32) -> (i32, i32) {
    %c0_i32 = arith.constant 0 : i32
    %c0_i32_0 = arith.constant 0 : i32
    %c0_i32_1 = arith.constant 0 : i32
    return %c0_i32, %c0_i32_0 : i32, i32
  }
  func.func @transform_10(%arg0: i32) -> (i32, i32) {
    %c0_i32 = arith.constant 0 : i32
    %c0_i32_0 = arith.constant 0 : i32
    %c0_i32_1 = arith.constant 0 : i32
    return %c0_i32, %c0_i32_0 : i32, i32
  }
  func.func @transform_11(%arg0: i32) -> (i32, i32) {
    %c0_i32 = arith.constant 0 : i32
    %c0_i32_0 = arith.constant 0 : i32
    return %c0_i32, %arg0 : i32, i32
  }
}

</mosaic_0001>

<bundles_post_ra>
// kernel: tpu_custom_call.1
= control target key start
LH: loop header
LB: loop body
LE: loop exit
PB: predicated region body
PF: predicated region fallthrough
CT: control target
= control target key end

     0   :  { %s4263_s0 = inlined_call_operand.vmem [shape: f32[8,1024], index: 0, kind: input, shape index: {}]   ;;  %s4264_s1 = inlined_call_operand.vmem [shape: f32[4,18,1024], index: 1, kind: input, shape index: {}]   ;;  %s4265_s2 = inlined_call_operand.vmem [shape: f32[52,8], index: 2, kind: input, shape index: {}]   ;;  %s4266_s3 = inlined_call_operand.vmem [shape: f32[52,18], index: 3, kind: input, shape index: {}]   ;;  %s4267_s4 = inlined_call_operand.vmem [shape: f32[52,1], index: 4, kind: input, shape index: {}]   ;;  %s4268_s5 = inlined_call_operand.vmem [shape: f32[8,52], index: 5, kind: input, shape index: {}]   ;;  %s4269_s6 = inlined_call_operand.vmem [shape: f32[8,1], index: 6, kind: input, shape index: {}]   ;;  %s4270_s7 = inlined_call_operand.vmem [shape: f32[24,8], index: 7, kind: input, shape index: {}]   ;;  %s4271_s8 = inlined_call_operand.vmem [shape: f32[24,8], index: 8, kind: input, shape index: {}]   ;;  %s4272_s9 = inlined_call_operand.vmem [shape: f32[24,1], index: 9, kind: input, shape index: {}]   ;;  %s4273_s10 = inlined_call_operand.vmem [shape: f32[24,1], index: 10, kind: input, shape index: {}]   ;;  %s4274_s11 = inlined_call_operand.hbm [shape: f32[8,1024], index: 11, kind: output, shape index: {}]  }
   0x1   :  { %4283 = sst [smem:[#allocation61_spill]] %s4263_s0 }
   0x2   :  { %16 = vsyncpa [#allocation4], 0 }
   0x3   :  { %18 = vsyncpa [#allocation4 + $0x1], 0  ;;  %s2803_s17 = smov 0   ;;  %s2805_s18 = smov 0  }
   0x4   :  { %s2807_s19 = smov 0   ;;  %s2809_s20 = smov 0  }
   0x5 LB: > { %s2824_s21 = sadd.s32 4294967295, %s2740_s20   ;;  %s2341_s22 = sadd.s32 4294967294, %s2740_s20   ;;  %s2740_s20 = sphi %s2809_s20, %s4412_s20   ;;  %s2736_s19 = sphi %s2807_s19, %s4411_s19   ;;  %s2732_s18 = sphi %s2805_s18, %s4410_s18   ;;  %s2728_s17 = sphi %s2803_s17, %s4409_s17  }
   0x6   : > { %s2828_s23 = sadd.s32 1, %s2740_s20   ;;  %s57_s24 = sadd.s32 1, %s2736_s19 }
   0x7   : > { %s54_s25 = ssub.s32 %s2740_s20, %s2828_s23  ;;  %p64_p0 = scmp.ne.s32.totalorder %s2736_s19, %s2732_s18 }
   0x8   : > { %p55_p1 = scmp.eq.s32.totalorder %s54_s25, 0  ;;  %p65_p2 = scmp.eq.s32.totalorder %s2740_s20, 0 }
   0x9   : > { %p283_p3 = scmp.eq.s32.totalorder %s2824_s21, 1  ;;  %p288_p4 = scmp.ne.s32.totalorder %s2732_s18, %s2728_s17 }
   0xa   : > { %s2840_s26 = scalar_select %p55_p1, %s2736_s19, %s57_s24  }
   0xb   : > { %p66_p5 = por %p65_p2, %p64_p0  ;;  %p2842_p6 = por %p283_p3, %p64_p0 }
   0xc   : > { %p289_p7 = scmp.eq.s32.totalorder %s2341_s22, 1  ;;  %p2343_p9 = scmp.ge.s32.totalorder %s2740_s20, 2 }
   0xe   : > { %p2846_p8 = por %p289_p7, %p288_p4  ;;  %332 = sbr.rel (%p2343_p9) target bundleno = 71 (0x47), region = 52 }
  0x13   : > { %344 = sbr.rel (!%p66_p5) target bundleno = 71 (0x47), region = 60  ;;  %s346_s29 = sand.u32 (%p66_p5), 1, %s2736_s19  }
  0x14   : > { %s2587_s30 = sshll.u32 (%p66_p5), %s2740_s20, 5  ;;  %s2589_s12 = smul.u32 (%p66_p5), 384, %s346_s29 }
  0x15   : > { %s2858_s15 = scalar_lea.vmem (%p66_p5), %s4264_s1, %s2587_s30 }
  0x16   : > { %v364_v0 = vld [vmem:[%s2858_s15] sm:$0xff] (%p66_p5)  ;;  %v366_v1 = vld [vmem:[%s2858_s15 + $0x8] sm:$0xff] (%p66_p5)  ;;  %v368_v2 = vld [vmem:[%s2858_s15 + $0x10] sm:$0xff] (%p66_p5)  ;;  %s2863_s16 = scalar_lea.vmem (%p66_p5), [#allocation2], %s2589_s12 }
  0x17   : > { %365 = vst [vmem:[%s2863_s16] sm:$0xff] (%p66_p5), %v364_v0  ;;  %v370_v3 = vld [vmem:[%s2858_s15 + $0x18] sm:$0xff] (%p66_p5)  ;;  %v372_v4 = vld [vmem:[%s2858_s15 + $0x40] sm:$0xff] (%p66_p5)  ;;  %v374_v5 = vld [vmem:[%s2858_s15 + $0x48] sm:$0xff] (%p66_p5) }
  0x18   : > { %367 = vst [vmem:[%s2863_s16 + $0x8] sm:$0xff] %v366_v1  ;;  %v376_v6 = vld [vmem:[%s2858_s15 + $0x50] sm:$0xff]  ;;  %v378_v7 = vld [vmem:[%s2858_s15 + $0x58] sm:$0xff]  ;;  %v380_v8 = vld [vmem:[%s2858_s15 + $0x80] sm:$0xff] }
  0x19   : > { %369 = vst [vmem:[%s2863_s16 + $0x10] sm:$0xff] %v368_v2  ;;  %v382_v9 = vld [vmem:[%s2858_s15 + $0x88] sm:$0xff]  ;;  %v384_v10 = vld [vmem:[%s2858_s15 + $0x90] sm:$0xff]  ;;  %v386_v11 = vld [vmem:[%s2858_s15 + $0x98] sm:$0xff] }
  0x1a   : > { %371 = vst [vmem:[%s2863_s16 + $0x18] sm:$0xff] %v370_v3  ;;  %v388_v12 = vld [vmem:[%s2858_s15 + $0xc0] sm:$0xff]  ;;  %v390_v13 = vld [vmem:[%s2858_s15 + $0xc8] sm:$0xff]  ;;  %v392_v14 = vld [vmem:[%s2858_s15 + $0xd0] sm:$0xff] }
  0x1b   : > { %373 = vst [vmem:[%s2863_s16 + $0x20] sm:$0xff] %v372_v4  ;;  %v394_v15 = vld [vmem:[%s2858_s15 + $0xd8] sm:$0xff]  ;;  %v396_v16 = vld [vmem:[%s2858_s15 + $0x100] sm:$0xff]  ;;  %v398_v17 = vld [vmem:[%s2858_s15 + $0x108] sm:$0xff] }
  0x1c   : > { %375 = vst [vmem:[%s2863_s16 + $0x28] sm:$0xff] %v374_v5  ;;  %v400_v18 = vld [vmem:[%s2858_s15 + $0x110] sm:$0xff]  ;;  %v402_v19 = vld [vmem:[%s2858_s15 + $0x118] sm:$0xff]  ;;  %v404_v20 = vld [vmem:[%s2858_s15 + $0x140] sm:$0xff] }
  0x1d   : > { %377 = vst [vmem:[%s2863_s16 + $0x30] sm:$0xff] %v376_v6  ;;  %v406_v21 = vld [vmem:[%s2858_s15 + $0x148] sm:$0xff]  ;;  %v408_v22 = vld [vmem:[%s2858_s15 + $0x150] sm:$0xff]  ;;  %v410_v23 = vld [vmem:[%s2858_s15 + $0x158] sm:$0xff] }
  0x1e   : > { %379 = vst [vmem:[%s2863_s16 + $0x38] sm:$0xff] %v378_v7  ;;  %v412_v24 = vld [vmem:[%s2858_s15 + $0x180] sm:$0xff]  ;;  %v414_v25 = vld [vmem:[%s2858_s15 + $0x188] sm:$0xff]  ;;  %v416_v26 = vld [vmem:[%s2858_s15 + $0x190] sm:$0xff] }
  0x1f   : > { %381 = vst [vmem:[%s2863_s16 + $0x40] sm:$0xff] %v380_v8  ;;  %v418_v27 = vld [vmem:[%s2858_s15 + $0x198] sm:$0xff]  ;;  %v420_v28 = vld [vmem:[%s2858_s15 + $0x1c0] sm:$0xff]  ;;  %v422_v29 = vld [vmem:[%s2858_s15 + $0x1c8] sm:$0xff] }
  0x20   : > { %383 = vst [vmem:[%s2863_s16 + $0x48] sm:$0xff] %v382_v9  ;;  %v424_v30 = vld [vmem:[%s2858_s15 + $0x1d0] sm:$0xff]  ;;  %v426_v31 = vld [vmem:[%s2858_s15 + $0x1d8] sm:$0xff]  ;;  %v428_v32 = vld [vmem:[%s2858_s15 + $0x200] sm:$0xff] }
  0x21   : > { %385 = vst [vmem:[%s2863_s16 + $0x50] sm:$0xff] %v384_v10  ;;  %v430_v33 = vld [vmem:[%s2858_s15 + $0x208] sm:$0xff]  ;;  %v432_v34 = vld [vmem:[%s2858_s15 + $0x210] sm:$0xff]  ;;  %v434_v35 = vld [vmem:[%s2858_s15 + $0x218] sm:$0xff] }
  0x22   : > { %387 = vst [vmem:[%s2863_s16 + $0x58] sm:$0xff] %v386_v11  ;;  %v436_v36 = vld [vmem:[%s2858_s15 + $0x240] sm:$0xff]  ;;  %v438_v37 = vld [vmem:[%s2858_s15 + $0x248] sm:$0xff]  ;;  %v440_v38 = vld [vmem:[%s2858_s15 + $0x250] sm:$0xff] }
  0x23   : > { %389 = vst [vmem:[%s2863_s16 + $0x60] sm:$0xff] %v388_v12  ;;  %v442_v39 = vld [vmem:[%s2858_s15 + $0x258] sm:$0xff]  ;;  %v444_v40 = vld [vmem:[%s2858_s15 + $0x280] sm:$0xff]  ;;  %v446_v41 = vld [vmem:[%s2858_s15 + $0x288] sm:$0xff] }
  0x24   : > { %391 = vst [vmem:[%s2863_s16 + $0x68] sm:$0xff] %v390_v13  ;;  %v448_v42 = vld [vmem:[%s2858_s15 + $0x290] sm:$0xff]  ;;  %v450_v43 = vld [vmem:[%s2858_s15 + $0x298] sm:$0xff]  ;;  %v452_v44 = vld [vmem:[%s2858_s15 + $0x2c0] sm:$0xff] }
  0x25   : > { %393 = vst [vmem:[%s2863_s16 + $0x70] sm:$0xff] %v392_v14  ;;  %v454_v45 = vld [vmem:[%s2858_s15 + $0x2c8] sm:$0xff]  ;;  %v456_v46 = vld [vmem:[%s2858_s15 + $0x2d0] sm:$0xff]  ;;  %v458_v47 = vld [vmem:[%s2858_s15 + $0x2d8] sm:$0xff] }
  0x26   : > { %395 = vst [vmem:[%s2863_s16 + $0x78] sm:$0xff] %v394_v15 }
  0x27   : > { %397 = vst [vmem:[%s2863_s16 + $0x80] sm:$0xff] %v396_v16 }
  0x28   : > { %399 = vst [vmem:[%s2863_s16 + $0x88] sm:$0xff] %v398_v17 }
  0x29   : > { %401 = vst [vmem:[%s2863_s16 + $0x90] sm:$0xff] %v400_v18 }
  0x2a   : > { %403 = vst [vmem:[%s2863_s16 + $0x98] sm:$0xff] %v402_v19 }
  0x2b   : > { %405 = vst [vmem:[%s2863_s16 + $0xa0] sm:$0xff] %v404_v20 }
  0x2c   : > { %407 = vst [vmem:[%s2863_s16 + $0xa8] sm:$0xff] %v406_v21 }
  0x2d   : > { %409 = vst [vmem:[%s2863_s16 + $0xb0] sm:$0xff] %v408_v22 }
  0x2e   : > { %411 = vst [vmem:[%s2863_s16 + $0xb8] sm:$0xff] %v410_v23 }
  0x2f   : > { %413 = vst [vmem:[%s2863_s16 + $0xc0] sm:$0xff] %v412_v24 }
  0x30   : > { %415 = vst [vmem:[%s2863_s16 + $0xc8] sm:$0xff] %v414_v25 }
  0x31   : > { %417 = vst [vmem:[%s2863_s16 + $0xd0] sm:$0xff] %v416_v26 }
  0x32   : > { %419 = vst [vmem:[%s2863_s16 + $0xd8] sm:$0xff] %v418_v27 }
  0x33   : > { %421 = vst [vmem:[%s2863_s16 + $0xe0] sm:$0xff] %v420_v28 }
  0x34   : > { %423 = vst [vmem:[%s2863_s16 + $0xe8] sm:$0xff] %v422_v29 }
  0x35   : > { %425 = vst [vmem:[%s2863_s16 + $0xf0] sm:$0xff] %v424_v30 }
  0x36   : > { %427 = vst [vmem:[%s2863_s16 + $0xf8] sm:$0xff] %v426_v31 }
  0x37   : > { %429 = vst [vmem:[%s2863_s16 + $0x100] sm:$0xff] %v428_v32 }
  0x38   : > { %431 = vst [vmem:[%s2863_s16 + $0x108] sm:$0xff] %v430_v33 }
  0x39   : > { %433 = vst [vmem:[%s2863_s16 + $0x110] sm:$0xff] %v432_v34 }
  0x3a   : > { %435 = vst [vmem:[%s2863_s16 + $0x118] sm:$0xff] %v434_v35 }
  0x3b   : > { %437 = vst [vmem:[%s2863_s16 + $0x120] sm:$0xff] %v436_v36 }
  0x3c   : > { %439 = vst [vmem:[%s2863_s16 + $0x128] sm:$0xff] %v438_v37 }
  0x3d   : > { %441 = vst [vmem:[%s2863_s16 + $0x130] sm:$0xff] %v440_v38 }
  0x3e   : > { %443 = vst [vmem:[%s2863_s16 + $0x138] sm:$0xff] %v442_v39 }
  0x3f   : > { %445 = vst [vmem:[%s2863_s16 + $0x140] sm:$0xff] %v444_v40 }
  0x40   : > { %447 = vst [vmem:[%s2863_s16 + $0x148] sm:$0xff] %v446_v41 }
  0x41   : > { %449 = vst [vmem:[%s2863_s16 + $0x150] sm:$0xff] %v448_v42 }
  0x42   : > { %451 = vst [vmem:[%s2863_s16 + $0x158] sm:$0xff] %v450_v43 }
  0x43   : > { %453 = vst [vmem:[%s2863_s16 + $0x160] sm:$0xff] %v452_v44 }
  0x44   : > { %455 = vst [vmem:[%s2863_s16 + $0x168] sm:$0xff] %v454_v45 }
  0x45   : > { %457 = vst [vmem:[%s2863_s16 + $0x170] sm:$0xff] %v456_v46 }
  0x46   : > { %459 = vst [vmem:[%s2863_s16 + $0x178] sm:$0xff] %v458_v47 }
  0x47 PF: > { %p2346_p10 = scmp.ge.s32.totalorder %s2740_s20, 1  ;;  %p464_p11 = scmp.lt.s32.totalorder %s2740_s20, 3 }
  0x49   : > { %p465_p12 = pnand %p2346_p10, %p464_p11 }
  0x4b   : > { %468 = sbr.rel (%p465_p12) target bundleno = 859 (0x35b), region = 83 }
  0x50   : > { %s2348_s22 = sshll.u32 %s2824_s21, 2  ;;  %v540_v48 = vld [vmem:[%s4267_s4 + $0x30] sm:$0xf]  ;;  %v2742_v49 = vmov 0   ;;  %s4286_s0 = sld [smem:[#allocation61_spill]]  ;;  %v527_v50 = vld [vmem:[%s4265_s2] sm:$0xff] }
  0x51   : > { %p516_p13 = scmp.lt.s32.totalorder %s2348_s22, 7  ;;  %2631 = vset.pattern.permute.xlu0 %v2742_v49  ;;  %2632 = vset.pattern.permute.xlu1 %v2742_v49  ;;  %vm576_vm0 = vcmask 64512   ;;  %v539_v55 = vld [vmem:[%s4267_s4 + $0x28] sm:$0xff]  ;;  %s2980_s24 = sand.u32 1, %s2732_s18   ;;  %v538_v56 = vld [vmem:[%s4267_s4 + $0x20] sm:$0xff]  ;;  %v537_v59 = vld [vmem:[%s4267_s4 + $0x18] sm:$0xff] }
  0x52   : > { %573 = vperm.xlu0 %2631, %v540_v48   ;;  %2633 = vset.pattern.permute.xlu2 %v2742_v49  ;;  %s2590_s30 = smul.u32 384, %s2980_s24  ;;  %v528_v57 = vld [vmem:[%s4265_s2 + $0x8] sm:$0xff]  ;;  %v534_v58 = vld [vmem:[%s4267_s4] sm:$0xff]  ;;  %v536_v60 = vld [vmem:[%s4267_s4 + $0x10] sm:$0xff]  ;;  %vm791_vm1 = vcmask 1041408   ;;  %vm769_vm2 = vcmask 146432  }
  0x53   : > { %s4414_s22 = smov (!%p516_p13, %s2348_s22), 7  ;;  %563 = vperm.xlu1 %2632, %v538_v56   ;;  %553 = vperm.xlu2 %2633, %v536_v60   ;;  %v529_v63 = vld [vmem:[%s4265_s2 + $0x10] sm:$0xff]  ;;  %v535_v0 = vld [vmem:[%s4267_s4 + $0x8] sm:$0xff]  ;;  %v530_v11 = vld [vmem:[%s4265_s2 + $0x18] sm:$0xff]  ;;  %vm1694_vm3 = vcmask 1043456   ;;  %vm1690_vm4 = vcmask 424960  }
  0x54   : > { %s2349_s29 = sshll.u32 %s4414_s22, 3  ;;  %s3006_s12 = scalar_lea.vmem [#allocation2], %s2590_s30  ;;  %v531_v12 = vld [vmem:[%s4265_s2 + $0x20] sm:$0xff]  ;;  %v532_v13 = vld [vmem:[%s4265_s2 + $0x28] sm:$0xff]  ;;  %v533_v14 = vld [vmem:[%s4265_s2 + $0x30] sm:$0xf] }
  0x55   : > { %v760_v61 = vld [vmem:[%s3006_s12 + $0x50] sm:$0x3]  ;;  %v761_v62 = vld [vmem:[%s3006_s12 + $0x58] sm:$0x3]  ;;  %v758_v1 = vld [vmem:[%s3006_s12 + $0x40] sm:$0x3] }
  0x56   : > { %s2967_s13 = scalar_lea.vmem %s4286_s0, %s2349_s29  ;;  %v759_v2 = vld [vmem:[%s3006_s12 + $0x48] sm:$0x3]  ;;  %v754_v3 = vld [vmem:[%s3006_s12 + $0x20] sm:$0xff]  ;;  %v756_v5 = vld [vmem:[%s3006_s12 + $0x30] sm:$0xff]  ;;  %s2588_s15 = sshll.u32 %s2824_s21, 5 }
  0x57   : > { %v523_v51 = vld [vmem:[%s2967_s13] sm:$0xff]  ;;  %v524_v52 = vld [vmem:[%s2967_s13 + $0x8] sm:$0xff]  ;;  %v525_v53 = vld [vmem:[%s2967_s13 + $0x10] sm:$0xff]  ;;  %s2259_s25 = scalar_lea.hbm %s4274_s11, %s2588_s15  ;;  %s2248_s29 = scalar_lea.sflag [#allocation4], %s2980_s24 }
  0x58   : > { %613 = vmatpush.msra.mxu0 %v523_v51  ;;  %651 = vmatpush.msra.mxu1 %v524_v52  ;;  %v526_v54 = vld [vmem:[%s2967_s13 + $0x18] sm:$0xff]  ;;  %v755_v4 = vld [vmem:[%s3006_s12 + $0x28] sm:$0xff]  ;;  %v750_v7 = vld [vmem:[%s3006_s12] sm:$0xff]  ;;  %s2698_s16 = scalar_lea.hbm %s4274_s11, 64 }
  0x59   : > { %689 = vmatpush.msra.mxu2 %v525_v53  ;;  %727 = vmatpush.msra.mxu3 %v526_v54  ;;  %v757_v6 = vld [vmem:[%s3006_s12 + $0x38] sm:$0xff]  ;;  %v751_v8 = vld [vmem:[%s3006_s12 + $0x8] sm:$0xff]  ;;  %v752_v9 = vld [vmem:[%s3006_s12 + $0x10] sm:$0xff] }
  0x5a   : > { %2350 = vmatmul.msk.f32.vlgmr.msra.gmra.mxu0 %vm576_vm0, %v527_v50  ;;  %2357 = vmatmul.msk.f32.vlgmr.msra.gmra.mxu1 %vm576_vm0, %v527_v50  ;;  %v753_v10 = vld [vmem:[%s3006_s12 + $0x18] sm:$0xff]  ;;  %v3065_v15 = vld [vmem:[%s4266_s3] sm:$0xff]  ;;  %v3078_v16 = vld [vmem:[%s4266_s3 + $0x8] sm:$0xff] }
  0x5b   : > { %2364 = vmatmul.msk.f32.vlgmr.msra.gmra.mxu2 %vm576_vm0, %v527_v50  ;;  %2371 = vmatmul.msk.f32.vlgmr.msra.gmra.mxu3 %vm576_vm0, %v527_v50  ;;  %v2420_v17 = vld [vmem:[%s3006_s12 + $0xb0] sm:$0x3]  ;;  %v2421_v18 = vld [vmem:[%s3006_s12 + $0xb8] sm:$0x3]  ;;  %v2418_v20 = vld [vmem:[%s3006_s12 + $0xa0] sm:$0x3] }
  0x5c   : > { %568 = vperm.xlu0 %2631, %v539_v55   ;;  %558 = vperm.xlu1 %2632, %v537_v59   ;;  %v3095_v19 = vld [vmem:[%s4266_s3 + $0x10] sm:$0xff]  ;;  %v2419_v21 = vld [vmem:[%s3006_s12 + $0xa8] sm:$0x3]  ;;  %v2414_v22 = vld [vmem:[%s3006_s12 + $0x80] sm:$0xff] }
  0x5d   : > { %2394 = vmatpush.msk.msrb.mxu2 %vm791_vm1, %v760_v61  ;;  %2402 = vmatpush.msk.msrb.mxu3 %vm791_vm1, %v761_v62  ;;  %v2415_v23 = vld [vmem:[%s3006_s12 + $0x88] sm:$0xff]  ;;  %v2416_v24 = vld [vmem:[%s3006_s12 + $0x90] sm:$0xff]  ;;  %v2417_v25 = vld [vmem:[%s3006_s12 + $0x98] sm:$0xff] }
  0x5e   : > { %2378 = vmatpush.msk.msrb.mxu0 %vm791_vm1, %v758_v1  ;;  %2386 = vmatpush.msk.msrb.mxu1 %vm791_vm1, %v759_v2  ;;  %v2410_v26 = vld [vmem:[%s3006_s12 + $0x60] sm:$0xff]  ;;  %v2411_v27 = vld [vmem:[%s3006_s12 + $0x68] sm:$0xff]  ;;  %v2412_v28 = vld [vmem:[%s3006_s12 + $0x70] sm:$0xff] }
  0x5f   : > { %548 = vperm.xlu2 %2633, %v535_v0   ;;  %894 = vmatpush.msrb.mxu2 %v756_v5  ;;  %v2413_v29 = vld [vmem:[%s3006_s12 + $0x78] sm:$0xff]  ;;  %v3133_v31 = vld [vmem:[%s4266_s3 + $0x20] sm:$0xff]  ;;  %v3146_v32 = vld [vmem:[%s4266_s3 + $0x28] sm:$0xff] }
  0x60   : > { %818 = vmatpush.msrb.mxu0 %v754_v3  ;;  %856 = vmatpush.msrb.mxu1 %v755_v4  ;;  %v3120_v30 = vld [vmem:[%s4266_s3 + $0x18] sm:$0xff]  ;;  %v3159_v33 = vld [vmem:[%s4266_s3 + $0x30] sm:$0xf]  ;;  %v2462_v38 = vld [vmem:[%s3006_s12 + $0x100] sm:$0x3] }
  0x61   : > { %932 = vmatpush.msrb.mxu3 %v757_v6  ;;  %895 = vmatpush.msrb.mxu2 %v752_v9  ;;  %v2464_v36 = vld [vmem:[%s3006_s12 + $0x110] sm:$0x3]  ;;  %v2465_v37 = vld [vmem:[%s3006_s12 + $0x118] sm:$0x3]  ;;  %v2463_v39 = vld [vmem:[%s3006_s12 + $0x108] sm:$0x3] }
  0x62   : > { %2351 = vmatmul.msk.f32.gmra.mxu0 %vm576_vm0, %v528_v57  ;;  %2358 = vmatmul.msk.f32.gmra.mxu1 %vm576_vm0, %v528_v57  ;;  %v2458_v44 = vld [vmem:[%s3006_s12 + $0xe0] sm:$0xff]  ;;  %v2459_v45 = vld [vmem:[%s3006_s12 + $0xe8] sm:$0xff]  ;;  %v2460_v46 = vld [vmem:[%s3006_s12 + $0xf0] sm:$0xff] }
  0x63   : > { %2365 = vmatmul.msk.f32.gmra.mxu2 %vm576_vm0, %v528_v57  ;;  %2372 = vmatmul.msk.f32.gmra.mxu3 %vm576_vm0, %v528_v57  ;;  %v2461_v47 = vld [vmem:[%s3006_s12 + $0xf8] sm:$0xff]  ;;  %v2454_v48 = vld [vmem:[%s3006_s12 + $0xc0] sm:$0xff]  ;;  %v2455_v49 = vld [vmem:[%s3006_s12 + $0xc8] sm:$0xff] }
  0x64   : > { %543 = vperm.xlu0 %2631, %v534_v58   ;;  %819 = vmatpush.msrb.mxu0 %v750_v7  ;;  %v2456_v50 = vld [vmem:[%s3006_s12 + $0xd0] sm:$0xff]  ;;  %v2457_v51 = vld [vmem:[%s3006_s12 + $0xd8] sm:$0xff] }
  0x65   : > { %857 = vmatpush.msrb.mxu1 %v751_v8  ;;  %933 = vmatpush.msrb.mxu3 %v753_v10 }
  0x66   : > { %2438 = vmatpush.msk.msra.mxu2 %vm791_vm1, %v2420_v17  ;;  %2422 = vmatpush.msk.msra.mxu0 %vm791_vm1, %v2418_v20  ;;  %v2508_v17 = vld [vmem:[%s3006_s12 + $0x170] sm:$0x3] }
  0x67   : > { %2446 = vmatpush.msk.msra.mxu3 %vm791_vm1, %v2421_v18  ;;  %2430 = vmatpush.msk.msra.mxu1 %vm791_vm1, %v2419_v21  ;;  %v2509_v18 = vld [vmem:[%s3006_s12 + $0x178] sm:$0x3] }
  0x68   : > { %1099 = vmatpush.msra.mxu2 %v2416_v24  ;;  %1023 = vmatpush.msra.mxu0 %v2414_v22  ;;  %v2507_v24 = vld [vmem:[%s3006_s12 + $0x168] sm:$0x3] }
  0x69   : > { %1137 = vmatpush.msra.mxu3 %v2417_v25  ;;  %1061 = vmatpush.msra.mxu1 %v2415_v23  ;;  %v2506_v23 = vld [vmem:[%s3006_s12 + $0x160] sm:$0x3] }
  0x6a   : > { %2352 = vmatmul.msk.f32.gmra.mxu0 %vm576_vm0, %v529_v63  ;;  %2359 = vmatmul.msk.f32.gmra.mxu1 %vm576_vm0, %v529_v63 }
  0x6b   : > { %2366 = vmatmul.msk.f32.gmra.mxu2 %vm576_vm0, %v529_v63  ;;  %2373 = vmatmul.msk.f32.gmra.mxu3 %vm576_vm0, %v529_v63 }
  0x6c   : > { %1100 = vmatpush.msra.mxu2 %v2412_v28  ;;  %1138 = vmatpush.msra.mxu3 %v2413_v29 }
  0x6d   : > { %1024 = vmatpush.msra.mxu0 %v2410_v26  ;;  %1062 = vmatpush.msra.mxu1 %v2411_v27 }
  0x72   : > { %2353 = vmatmul.msk.f32.gmra.mxu0 %vm576_vm0, %v530_v11  ;;  %2360 = vmatmul.msk.f32.gmra.mxu1 %vm576_vm0, %v530_v11 }
  0x73   : > { %2367 = vmatmul.msk.f32.gmra.mxu2 %vm576_vm0, %v530_v11  ;;  %2374 = vmatmul.msk.f32.gmra.mxu3 %vm576_vm0, %v530_v11 }
  0x7a   : > { %2354 = vmatmul.msk.f32.gmra.mxu0 %vm576_vm0, %v531_v12  ;;  %2361 = vmatmul.msk.f32.gmra.mxu1 %vm576_vm0, %v531_v12 }
  0x7b   : > { %2368 = vmatmul.msk.f32.gmra.mxu2 %vm576_vm0, %v531_v12  ;;  %2375 = vmatmul.msk.f32.gmra.mxu3 %vm576_vm0, %v531_v12 }
  0x82   : > { %2355 = vmatmul.msk.f32.gmra.mxu0 %vm576_vm0, %v532_v13  ;;  %2362 = vmatmul.msk.f32.gmra.mxu1 %vm576_vm0, %v532_v13 }
  0x83   : > { %2369 = vmatmul.msk.f32.gmra.mxu2 %vm576_vm0, %v532_v13  ;;  %2376 = vmatmul.msk.f32.gmra.mxu3 %vm576_vm0, %v532_v13 }
  0x8a   : > { %2356 = vmatmul.msk.f32.gmra.mxu0 %vm576_vm0, %v533_v14  ;;  %2363 = vmatmul.msk.f32.gmra.mxu1 %vm576_vm0, %v533_v14 }
  0x8b   : > { %2370 = vmatmul.msk.f32.gmra.mxu2 %vm576_vm0, %v533_v14  ;;  %2377 = vmatmul.msk.f32.gmra.mxu3 %vm576_vm0, %v533_v14 }
  0x92   : > { %2379 = vmatmul.msk.f32.vlgmr.msrb.gmra.mxu0 %vm769_vm2, %v3065_v15  ;;  %2387 = vmatmul.msk.f32.vlgmr.msrb.gmra.mxu1 %vm769_vm2, %v3065_v15 }
  0x93   : > { %2395 = vmatmul.msk.f32.vlgmr.msrb.gmra.mxu2 %vm769_vm2, %v3065_v15  ;;  %2403 = vmatmul.msk.f32.vlgmr.msrb.gmra.mxu3 %vm769_vm2, %v3065_v15 }
  0x94   : > { %2482 = vmatpush.msk.msrb.mxu2 %vm791_vm1, %v2464_v36  ;;  %2490 = vmatpush.msk.msrb.mxu3 %vm791_vm1, %v2465_v37  ;;  %v2502_v37 = vld [vmem:[%s3006_s12 + $0x140] sm:$0xff] }
  0x95   : > { %2466 = vmatpush.msk.msrb.mxu0 %vm791_vm1, %v2462_v38  ;;  %2474 = vmatpush.msk.msrb.mxu1 %vm791_vm1, %v2463_v39  ;;  %v2503_v38 = vld [vmem:[%s3006_s12 + $0x148] sm:$0xff]  ;;  %v2504_v39 = vld [vmem:[%s3006_s12 + $0x150] sm:$0xff] }
  0x96   : > { %1332 = vmatpush.msrb.mxu2 %v2460_v46  ;;  %1370 = vmatpush.msrb.mxu3 %v2461_v47  ;;  %v2500_v46 = vld [vmem:[%s3006_s12 + $0x130] sm:$0xff]  ;;  %v2501_v47 = vld [vmem:[%s3006_s12 + $0x138] sm:$0xff] }
  0x97   : > { %1256 = vmatpush.msrb.mxu0 %v2458_v44  ;;  %1294 = vmatpush.msrb.mxu1 %v2459_v45  ;;  %v2499_v44 = vld [vmem:[%s3006_s12 + $0x128] sm:$0xff] }
  0x98   : > { %1333 = vmatpush.msrb.mxu2 %v2456_v50  ;;  %1371 = vmatpush.msrb.mxu3 %v2457_v51 }
  0x99   : > { %1257 = vmatpush.msrb.mxu0 %v2454_v48  ;;  %1295 = vmatpush.msrb.mxu1 %v2455_v49 }
  0x9a   : > { %2380 = vmatmul.msk.f32.gmra.mxu0 %vm769_vm2, %v3078_v16  ;;  %2388 = vmatmul.msk.f32.gmra.mxu1 %vm769_vm2, %v3078_v16 }
  0x9b   : > { %2396 = vmatmul.msk.f32.gmra.mxu2 %vm769_vm2, %v3078_v16  ;;  %2404 = vmatmul.msk.f32.gmra.mxu3 %vm769_vm2, %v3078_v16 }
  0xa2   : > { %2381 = vmatmul.msk.f32.gmra.mxu0 %vm769_vm2, %v3095_v19  ;;  %2389 = vmatmul.msk.f32.gmra.mxu1 %vm769_vm2, %v3095_v19 }
  0xa3   : > { %2397 = vmatmul.msk.f32.gmra.mxu2 %vm769_vm2, %v3095_v19  ;;  %2405 = vmatmul.msk.f32.gmra.mxu3 %vm769_vm2, %v3095_v19 }
  0xaa   : > { %2382 = vmatmul.msk.f32.gmra.mxu0 %vm769_vm2, %v3120_v30  ;;  %2390 = vmatmul.msk.f32.gmra.mxu1 %vm769_vm2, %v3120_v30 }
  0xab   : > { %2398 = vmatmul.msk.f32.gmra.mxu2 %vm769_vm2, %v3120_v30  ;;  %2406 = vmatmul.msk.f32.gmra.mxu3 %vm769_vm2, %v3120_v30 }
  0xad   : > { %v3321_v14 = vpop.permute.xlu2 %553 }
  0xae   : > { %4296 = vst [vmem:[#allocation15_spill] sm:$0xff] %v3321_v14 }
  0xb2   : > { %2383 = vmatmul.msk.f32.gmra.mxu0 %vm769_vm2, %v3133_v31  ;;  %2391 = vmatmul.msk.f32.gmra.mxu1 %vm769_vm2, %v3133_v31 }
  0xb3   : > { %2399 = vmatmul.msk.f32.gmra.mxu2 %vm769_vm2, %v3133_v31  ;;  %2407 = vmatmul.msk.f32.gmra.mxu3 %vm769_vm2, %v3133_v31 }
  0xb9   : > { %v3365_v45 = vpop.permute.xlu2 %548 }
  0xba   : > { %2384 = vmatmul.msk.f32.gmra.mxu0 %vm769_vm2, %v3146_v32  ;;  %2392 = vmatmul.msk.f32.gmra.mxu1 %vm769_vm2, %v3146_v32 }
  0xbb   : > { %2400 = vmatmul.msk.f32.gmra.mxu2 %vm769_vm2, %v3146_v32  ;;  %2408 = vmatmul.msk.f32.gmra.mxu3 %vm769_vm2, %v3146_v32 }
  0xc2   : > { %2385 = vmatmul.msk.f32.gmra.mxu0 %vm769_vm2, %v3159_v33  ;;  %2393 = vmatmul.msk.f32.gmra.mxu1 %vm769_vm2, %v3159_v33 }
  0xc3   : > { %2401 = vmatmul.msk.f32.gmra.mxu2 %vm769_vm2, %v3159_v33  ;;  %2409 = vmatmul.msk.f32.gmra.mxu3 %vm769_vm2, %v3159_v33 }
  0xc4   : > { %v3277_v0 = vpop.permute.xlu0 %573 }
  0xc5   : > { %4291 = vst [vmem:[#allocation10_spill] sm:$0xff] %v3277_v0 }
  0xca   : > { %2423 = vmatmul.msk.f32.vlgmr.msra.gmra.mxu0 %vm769_vm2, %v3065_v15  ;;  %2431 = vmatmul.msk.f32.vlgmr.msra.gmra.mxu1 %vm769_vm2, %v3065_v15 }
  0xcb   : > { %2439 = vmatmul.msk.f32.vlgmr.msra.gmra.mxu2 %vm769_vm2, %v3065_v15  ;;  %2447 = vmatmul.msk.f32.vlgmr.msra.gmra.mxu3 %vm769_vm2, %v3065_v15 }
  0xcc   : > { %2526 = vmatpush.msk.msra.mxu2 %vm791_vm1, %v2508_v17  ;;  %2534 = vmatpush.msk.msra.mxu3 %vm791_vm1, %v2509_v18 }
  0xcd   : > { %2510 = vmatpush.msk.msra.mxu0 %vm791_vm1, %v2506_v23  ;;  %2518 = vmatpush.msk.msra.mxu1 %vm791_vm1, %v2507_v24 }
  0xce   : > { %v3303_v9 = vpop.permute.xlu0 %568  ;;  %1565 = vmatpush.msra.mxu2 %v2504_v39 }
  0xcf   : > { %1489 = vmatpush.msra.mxu0 %v2502_v37  ;;  %1527 = vmatpush.msra.mxu1 %v2503_v38 }
  0xd0   : > { %1566 = vmatpush.msra.mxu2 %v2500_v46 }
  0xd1   : > { %1528 = vmatpush.msra.mxu1 %v2499_v44 }
  0xd2   : > { %2424 = vmatmul.msk.f32.gmra.mxu0 %vm769_vm2, %v3078_v16  ;;  %2432 = vmatmul.msk.f32.gmra.mxu1 %vm769_vm2, %v3078_v16 }
  0xd3   : > { %2440 = vmatmul.msk.f32.gmra.mxu2 %vm769_vm2, %v3078_v16  ;;  %2448 = vmatmul.msk.f32.gmra.mxu3 %vm769_vm2, %v3078_v16 }
  0xd6   : > { %v3325_v20 = vpop.permute.xlu0 %543 }
  0xd7   : > { %v3185_v34 = vpop.f32.mrf.mxu0  ;;  %v3187_v35 = vpop.f32.mrf.mxu1 }
  0xda   : > { %2425 = vmatmul.msk.f32.gmra.mxu0 %vm769_vm2, %v3095_v19  ;;  %2433 = vmatmul.msk.f32.gmra.mxu1 %vm769_vm2, %v3095_v19 }
  0xdb   : > { %2441 = vmatmul.msk.f32.gmra.mxu2 %vm769_vm2, %v3095_v19  ;;  %2449 = vmatmul.msk.f32.gmra.mxu3 %vm769_vm2, %v3095_v19 }
  0xde   : > { %v3203_v40 = vpop.f32.mrf.mxu2  ;;  %v3205_v41 = vpop.f32.mrf.mxu3 }
  0xdf   : > { %v3209_v42 = vpop.f32.mrf.mxu0  ;;  %v3211_v43 = vpop.f32.mrf.mxu1  ;;  %v3339_v21 = vadd.f32 %v3203_v40, %v3325_v20  ;;  %v3343_v22 = vadd.f32 %v3205_v41, %v3325_v20  ;;  %v2505_v40 = vld [vmem:[%s3006_s12 + $0x158] sm:$0xff]  ;;  %v2498_v41 = vld [vmem:[%s3006_s12 + $0x120] sm:$0xff]  ;;  %s2347_s12 = sshll.u32 %s2980_s24, 5 }
  0xe0   : > { %1603 = vmatpush.msra.mxu3 %v2505_v40  ;;  %1490 = vmatpush.msra.mxu0 %v2498_v41  ;;  %s4215_s14 = scalar_lea.vmem [#allocation3], %s2347_s12 }
  0xe1   : > { %s2261_s21 = sshll.u32 %s4215_s14, 4  ;;  %s2262_s21 = int_to_ptr.vmem [resolvable:$true] %s2261_s21 }
  0xe2   : > { %2426 = vmatmul.msk.f32.gmra.mxu0 %vm769_vm2, %v3120_v30  ;;  %2434 = vmatmul.msk.f32.gmra.mxu1 %vm769_vm2, %v3120_v30 }
  0xe3   : > { %2442 = vmatmul.msk.f32.gmra.mxu2 %vm769_vm2, %v3120_v30  ;;  %2450 = vmatmul.msk.f32.gmra.mxu3 %vm769_vm2, %v3120_v30 }
  0xe4   : > { %1604 = vmatpush.msra.mxu3 %v2501_v47 }
  0xe6   : > { %v3229_v52 = vpop.f32.mrf.mxu2  ;;  %v3231_v53 = vpop.f32.mrf.mxu3 }
  0xe7   : > { %v3233_v54 = vpop.f32.mrf.mxu0  ;;  %v3235_v55 = vpop.f32.mrf.mxu1  ;;  %v3379_v48 = vadd.f32 %v3229_v52, %v3365_v45  ;;  %v3383_v49 = vadd.f32 %v3231_v53, %v3365_v45 }
  0xe8   : > { %4287 = vst [vmem:[#allocation6_spill] sm:$0xff] %v3233_v54  ;;  %v3395_v52 = vpop.permute.xlu1 %563 }
  0xe9   : > { %4288 = vst [vmem:[#allocation7_spill] sm:$0xff] %v3235_v55 }
  0xea   : > { %2427 = vmatmul.msk.f32.gmra.mxu0 %vm769_vm2, %v3133_v31  ;;  %2435 = vmatmul.msk.f32.gmra.mxu1 %vm769_vm2, %v3133_v31 }
  0xeb   : > { %2443 = vmatmul.msk.f32.gmra.mxu2 %vm769_vm2, %v3133_v31  ;;  %2451 = vmatmul.msk.f32.gmra.mxu3 %vm769_vm2, %v3133_v31 }
  0xee   : > { %v3245_v56 = vpop.f32.mrf.mxu2  ;;  %v3247_v57 = vpop.f32.mrf.mxu3 }
  0xef   : > { %v3249_v58 = vpop.f32.mrf.mxu0  ;;  %v3251_v59 = vpop.f32.mrf.mxu1  ;;  %v3407_v53 = vadd.f32 %v3245_v56, %v3321_v14 }
  0xf0   : > { %4289 = vst [vmem:[#allocation8_spill] sm:$0xff] %v3249_v58  ;;  %v3423_v44 = vpop.permute.xlu1 %558  ;;  %v1926_v58 = vld [vmem:[%s4273_s10 + $0x10] sm:$0xff] }
  0xf1   : > { %4290 = vst [vmem:[#allocation9_spill] sm:$0xff] %v3251_v59 }
  0xf2   : > { %2428 = vmatmul.msk.f32.gmra.mxu0 %vm769_vm2, %v3146_v32  ;;  %2436 = vmatmul.msk.f32.gmra.mxu1 %vm769_vm2, %v3146_v32  ;;  %4303 = vst [vmem:[#allocation22_spill] sm:$0xff] %v3423_v44 }
  0xf3   : > { %2444 = vmatmul.msk.f32.gmra.mxu2 %vm769_vm2, %v3146_v32  ;;  %2452 = vmatmul.msk.f32.gmra.mxu3 %vm769_vm2, %v3146_v32 }
  0xf6   : > { %v3261_v60 = vpop.f32.mrf.mxu2  ;;  %v3263_v61 = vpop.f32.mrf.mxu3 }
  0xf7   : > { %v3265_v62 = vpop.f32.mrf.mxu0  ;;  %v3267_v63 = vpop.f32.mrf.mxu1  ;;  %v3435_v56 = vadd.f32 %v3261_v60, %v3423_v44 }
  0xfa   : > { %2429 = vmatmul.msk.f32.gmra.mxu0 %vm769_vm2, %v3159_v33  ;;  %2437 = vmatmul.msk.f32.gmra.mxu1 %vm769_vm2, %v3159_v33 }
  0xfb   : > { %2445 = vmatmul.msk.f32.gmra.mxu2 %vm769_vm2, %v3159_v33  ;;  %2453 = vmatmul.msk.f32.gmra.mxu3 %vm769_vm2, %v3159_v33 }
  0xfe   : > { %v3279_v1 = vpop.f32.mrf.mxu2  ;;  %v3281_v2 = vpop.f32.mrf.mxu3 }
  0xff   : > { %v3283_v3 = vpop.f32.mrf.mxu0  ;;  %v3285_v4 = vpop.f32.mrf.mxu1 }
 0x102   : > { %2467 = vmatmul.msk.f32.vlgmr.msrb.gmra.mxu0 %vm769_vm2, %v3065_v15  ;;  %2475 = vmatmul.msk.f32.vlgmr.msrb.gmra.mxu1 %vm769_vm2, %v3065_v15 }
 0x103   : > { %2483 = vmatmul.msk.f32.vlgmr.msrb.gmra.mxu2 %vm769_vm2, %v3065_v15  ;;  %2491 = vmatmul.msk.f32.vlgmr.msrb.gmra.mxu3 %vm769_vm2, %v3065_v15 }
 0x106   : > { %v3295_v5 = vpop.f32.mrf.mxu2  ;;  %v3297_v6 = vpop.f32.mrf.mxu3 }
 0x107   : > { %v3299_v7 = vpop.f32.mrf.mxu0  ;;  %v3301_v8 = vpop.f32.mrf.mxu1 }
 0x108   : > { %4292 = vst [vmem:[#allocation11_spill] sm:$0xff] %v3299_v7 }
 0x109   : > { %4293 = vst [vmem:[#allocation12_spill] sm:$0xff] %v3301_v8 }
 0x10a   : > { %2468 = vmatmul.msk.f32.gmra.mxu0 %vm769_vm2, %v3078_v16  ;;  %2476 = vmatmul.msk.f32.gmra.mxu1 %vm769_vm2, %v3078_v16 }
 0x10b   : > { %2484 = vmatmul.msk.f32.gmra.mxu2 %vm769_vm2, %v3078_v16  ;;  %2492 = vmatmul.msk.f32.gmra.mxu3 %vm769_vm2, %v3078_v16 }
 0x10e   : > { %v3313_v10 = vpop.f32.mrf.mxu2  ;;  %v3315_v11 = vpop.f32.mrf.mxu3 }
 0x10f   : > { %v3317_v12 = vpop.f32.mrf.mxu0  ;;  %v3319_v13 = vpop.f32.mrf.mxu1 }
 0x110   : > { %4294 = vst [vmem:[#allocation13_spill] sm:$0xff] %v3317_v12 }
 0x111   : > { %4295 = vst [vmem:[#allocation14_spill] sm:$0xff] %v3319_v13 }
 0x112   : > { %2469 = vmatmul.msk.f32.gmra.mxu0 %vm769_vm2, %v3095_v19  ;;  %2477 = vmatmul.msk.f32.gmra.mxu1 %vm769_vm2, %v3095_v19 }
 0x113   : > { %2485 = vmatmul.msk.f32.gmra.mxu2 %vm769_vm2, %v3095_v19  ;;  %2493 = vmatmul.msk.f32.gmra.mxu3 %vm769_vm2, %v3095_v19 }
 0x116   : > { %v897_v25 = vpop.f32.mrf.mxu2  ;;  %v935_v26 = vpop.f32.mrf.mxu3 }
 0x117   : > { %v3350_v27 = vadd.f32 %v897_v25, %v3339_v21  ;;  %v3353_v28 = vadd.f32 %v935_v26, %v3343_v22  ;;  %v3355_v29 = vpop.f32.mrf.mxu0  ;;  %v3357_v36 = vpop.f32.mrf.mxu1  ;;  %v3411_v25 = vadd.f32 %v3247_v57, %v3321_v14  ;;  %v3439_v57 = vadd.f32 %v3263_v61, %v3423_v44 }
 0x118   : > { %4297 = vst [vmem:[#allocation16_spill] sm:$0xff] %v3355_v29 }
 0x119   : > { %4298 = vst [vmem:[#allocation17_spill] sm:$0xff] %v3357_v36  ;;  %v1924_v36 = vld [vmem:[%s4273_s10] sm:$0xff]  ;;  %v959_v44 = vmax.f32 %v3353_v28, 0.0 }
 0x11a   : > { %2470 = vmatmul.msk.f32.gmra.mxu0 %vm769_vm2, %v3120_v30  ;;  %2478 = vmatmul.msk.f32.gmra.mxu1 %vm769_vm2, %v3120_v30 }
 0x11b   : > { %2486 = vmatmul.msk.f32.gmra.mxu2 %vm769_vm2, %v3120_v30  ;;  %2494 = vmatmul.msk.f32.gmra.mxu3 %vm769_vm2, %v3120_v30 }
 0x11c   : > { %1929 = vperm.xlu0 %2631, %v1924_v36  }
 0x11e   : > { %v900_v50 = vpop.f32.mrf.mxu2  ;;  %v938_v51 = vpop.f32.mrf.mxu3 }
 0x11f   : > { %v3386_v17 = vadd.f32 %v900_v50, %v3379_v48  ;;  %v3389_v18 = vadd.f32 %v938_v51, %v3383_v49  ;;  %v3391_v23 = vpop.f32.mrf.mxu0  ;;  %v3393_v24 = vpop.f32.mrf.mxu1 }
 0x120   : > { %4299 = vst [vmem:[#allocation18_spill] sm:$0xff] %v3391_v23 }
 0x121   : > { %4300 = vst [vmem:[#allocation19_spill] sm:$0xff] %v3393_v24 }
 0x122   : > { %2471 = vmatmul.msk.f32.gmra.mxu0 %vm769_vm2, %v3133_v31  ;;  %2479 = vmatmul.msk.f32.gmra.mxu1 %vm769_vm2, %v3133_v31 }
 0x123   : > { %2487 = vmatmul.msk.f32.gmra.mxu2 %vm769_vm2, %v3133_v31  ;;  %2495 = vmatmul.msk.f32.gmra.mxu3 %vm769_vm2, %v3133_v31 }
 0x124   : > { %1939 = vperm.xlu0 %2631, %v1926_v58   ;;  %v1792_v58 = vld [vmem:[%s4272_s9 + $0x10] sm:$0xff] }
 0x126   : > { %v903_v26 = vpop.f32.mrf.mxu2  ;;  %v941_v37 = vpop.f32.mrf.mxu3 }
 0x127   : > { %v3414_v38 = vadd.f32 %v903_v26, %v3407_v53  ;;  %v3417_v39 = vadd.f32 %v941_v37, %v3411_v25  ;;  %v3419_v40 = vpop.f32.mrf.mxu0  ;;  %v3421_v41 = vpop.f32.mrf.mxu1 }
 0x128   : > { %4301 = vst [vmem:[#allocation20_spill] sm:$0xff] %v3419_v40 }
 0x129   : > { %4302 = vst [vmem:[#allocation21_spill] sm:$0xff] %v3421_v41 }
 0x12a   : > { %2472 = vmatmul.msk.f32.gmra.mxu0 %vm769_vm2, %v3146_v32  ;;  %2480 = vmatmul.msk.f32.gmra.mxu1 %vm769_vm2, %v3146_v32 }
 0x12b   : > { %2488 = vmatmul.msk.f32.gmra.mxu2 %vm769_vm2, %v3146_v32  ;;  %2496 = vmatmul.msk.f32.gmra.mxu3 %vm769_vm2, %v3146_v32 }
 0x12e   : > { %v906_v46 = vpop.f32.mrf.mxu2  ;;  %v944_v47 = vpop.f32.mrf.mxu3 }
 0x12f   : > { %v3442_v50 = vadd.f32 %v906_v46, %v3435_v56  ;;  %v3445_v51 = vadd.f32 %v944_v47, %v3439_v57  ;;  %v3447_v26 = vpop.f32.mrf.mxu0  ;;  %v3449_v37 = vpop.f32.mrf.mxu1 }
 0x132   : > { %2473 = vmatmul.msk.f32.gmra.mxu0 %vm769_vm2, %v3159_v33  ;;  %2481 = vmatmul.msk.f32.gmra.mxu1 %vm769_vm2, %v3159_v33 }
 0x133   : > { %2489 = vmatmul.msk.f32.gmra.mxu2 %vm769_vm2, %v3159_v33  ;;  %2497 = vmatmul.msk.f32.gmra.mxu3 %vm769_vm2, %v3159_v33 }
 0x136   : > { %v3459_v60 = vpop.f32.mrf.mxu2  ;;  %v3461_v61 = vpop.f32.mrf.mxu3 }
 0x137   : > { %v3463_v46 = vpop.f32.mrf.mxu0  ;;  %v3465_v47 = vpop.f32.mrf.mxu1 }
 0x13a   : > { %2511 = vmatmul.msk.f32.vlgmr.msra.gmra.mxu0 %vm769_vm2, %v3065_v15  ;;  %2519 = vmatmul.msk.f32.vlgmr.msra.gmra.mxu1 %vm769_vm2, %v3065_v15 }
 0x13b   : > { %2527 = vmatmul.msk.f32.vlgmr.msra.gmra.mxu2 %vm769_vm2, %v3065_v15  ;;  %2535 = vmatmul.msk.f32.vlgmr.msra.gmra.mxu3 %vm769_vm2, %v3065_v15  ;;  %v1684_v15 = vld [vmem:[%s4269_s6] sm:$0xff] }
 0x13c   : > { %1687 = vperm.xlu1 %2632, %v1684_v15  }
 0x13e   : > { %v3475_v41 = vpop.f32.mrf.mxu2  ;;  %v3477_v40 = vpop.f32.mrf.mxu3 }
 0x13f   : > { %v3479_v24 = vpop.f32.mrf.mxu0  ;;  %v3481_v8 = vpop.f32.mrf.mxu1 }
 0x140   : > { %4304 = vst [vmem:[#allocation23_spill] sm:$0xff] %v3479_v24 }
 0x141   : > { %4305 = vst [vmem:[#allocation24_spill] sm:$0xff] %v3481_v8 }
 0x142   : > { %2512 = vmatmul.msk.f32.gmra.mxu0 %vm769_vm2, %v3078_v16  ;;  %2520 = vmatmul.msk.f32.gmra.mxu1 %vm769_vm2, %v3078_v16 }
 0x143   : > { %2528 = vmatmul.msk.f32.gmra.mxu2 %vm769_vm2, %v3078_v16  ;;  %2536 = vmatmul.msk.f32.gmra.mxu3 %vm769_vm2, %v3078_v16  ;;  %v1791_v16 = vld [vmem:[%s4272_s9 + $0x8] sm:$0xff] }
 0x144   : > { %1800 = vperm.xlu1 %2632, %v1791_v16  }
 0x146   : > { %v3494_v24 = vpop.f32.mrf.mxu2  ;;  %v3496_v8 = vpop.f32.mrf.mxu3 }
 0x147   : > { %v3498_v7 = vpop.f32.mrf.mxu0  ;;  %v3500_v23 = vpop.f32.mrf.mxu1 }
 0x148   : > { %4306 = vst [vmem:[#allocation25_spill] sm:$0xff] %v3498_v7 }
 0x149   : > { %4307 = vst [vmem:[#allocation26_spill] sm:$0xff] %v3500_v23 }
 0x14a   : > { %2513 = vmatmul.msk.f32.gmra.mxu0 %vm769_vm2, %v3095_v19  ;;  %2521 = vmatmul.msk.f32.gmra.mxu1 %vm769_vm2, %v3095_v19 }
 0x14b   : > { %2529 = vmatmul.msk.f32.gmra.mxu2 %vm769_vm2, %v3095_v19  ;;  %2537 = vmatmul.msk.f32.gmra.mxu3 %vm769_vm2, %v3095_v19  ;;  %v958_v19 = vmax.f32 %v3350_v27, 0.0 }
 0x14c   : > { %1805 = vperm.xlu1 %2632, %v1792_v58  }
 0x14e   : > { %v1102_v15 = vpop.f32.mrf.mxu2  ;;  %v1140_v23 = vpop.f32.mrf.mxu3 }
 0x14f   : > { %v1103_v36 = vadd.f32 %v1102_v15, %v3339_v21  ;;  %v1141_v7 = vadd.f32 %v1140_v23, %v3343_v22  ;;  %v3518_v29 = vpop.f32.mrf.mxu0  ;;  %v3520_v59 = vpop.f32.mrf.mxu1 }
 0x150   : > { %4308 = vst [vmem:[#allocation27_spill] sm:$0xff] %v3518_v29 }
 0x151   : > { %4309 = vst [vmem:[#allocation28_spill] sm:$0xff] %v3520_v59  ;;  %v1163_v16 = vmax.f32 %v1103_v36, 0.0  ;;  %v1164_v55 = vmax.f32 %v1141_v7, 0.0 }
 0x152   : > { %2514 = vmatmul.msk.f32.gmra.mxu0 %vm769_vm2, %v3120_v30  ;;  %2522 = vmatmul.msk.f32.gmra.mxu1 %vm769_vm2, %v3120_v30 }
 0x153   : > { %v3531_v23 = vadd.f32 %v1163_v16, %v958_v19  ;;  %v3533_v15 = vadd.f32 %v1164_v55, %v959_v44  ;;  %2530 = vmatmul.msk.f32.gmra.mxu2 %vm769_vm2, %v3120_v30  ;;  %2538 = vmatmul.msk.f32.gmra.mxu3 %vm769_vm2, %v3120_v30  ;;  %v962_v44 = vmax.f32 %v3386_v17, 0.0  ;;  %v963_v16 = vmax.f32 %v3389_v18, 0.0 }
 0x156   : > { %v1105_v7 = vpop.f32.mrf.mxu2  ;;  %v1143_v27 = vpop.f32.mrf.mxu3 }
 0x157   : > { %v1106_v28 = vadd.f32 %v1105_v7, %v3379_v48  ;;  %v1144_v36 = vadd.f32 %v1143_v27, %v3383_v49  ;;  %v3544_v19 = vpop.f32.mrf.mxu0  ;;  %v3546_v55 = vpop.f32.mrf.mxu1 }
 0x158   : > { %4310 = vst [vmem:[#allocation29_spill] sm:$0xff] %v3544_v19 }
 0x159   : > { %4311 = vst [vmem:[#allocation30_spill] sm:$0xff] %v3546_v55  ;;  %v1167_v30 = vmax.f32 %v1106_v28, 0.0  ;;  %v1168_v59 = vmax.f32 %v1144_v36, 0.0 }
 0x15a   : > { %2515 = vmatmul.msk.f32.gmra.mxu0 %vm769_vm2, %v3133_v31  ;;  %2523 = vmatmul.msk.f32.gmra.mxu1 %vm769_vm2, %v3133_v31 }
 0x15b   : > { %v3554_v58 = vadd.f32 %v1167_v30, %v962_v44  ;;  %v3556_v7 = vadd.f32 %v1168_v59, %v963_v16  ;;  %2531 = vmatmul.msk.f32.gmra.mxu2 %vm769_vm2, %v3133_v31  ;;  %2539 = vmatmul.msk.f32.gmra.mxu3 %vm769_vm2, %v3133_v31  ;;  %v966_v44 = vmax.f32 %v3414_v38, 0.0  ;;  %v967_v59 = vmax.f32 %v3417_v39, 0.0 }
 0x15e   : > { %v1108_v17 = vpop.f32.mrf.mxu2  ;;  %v1146_v18 = vpop.f32.mrf.mxu3 }
 0x15f   : > { %v1109_v27 = vadd.f32 %v1108_v17, %v3407_v53  ;;  %v1147_v28 = vadd.f32 %v1146_v18, %v3411_v25  ;;  %v3564_v36 = vpop.f32.mrf.mxu0  ;;  %v3566_v55 = vpop.f32.mrf.mxu1 }
 0x160   : > { %4312 = vst [vmem:[#allocation31_spill] sm:$0xff] %v3564_v36 }
 0x161   : > { %4313 = vst [vmem:[#allocation32_spill] sm:$0xff] %v3566_v55  ;;  %v1171_v16 = vmax.f32 %v1109_v27, 0.0  ;;  %v1172_v30 = vmax.f32 %v1147_v28, 0.0 }
 0x162   : > { %2516 = vmatmul.msk.f32.gmra.mxu0 %vm769_vm2, %v3146_v32  ;;  %2524 = vmatmul.msk.f32.gmra.mxu1 %vm769_vm2, %v3146_v32 }
 0x163   : > { %v3574_v31 = vadd.f32 %v1171_v16, %v966_v44  ;;  %v3576_v17 = vadd.f32 %v1172_v30, %v967_v59  ;;  %2532 = vmatmul.msk.f32.gmra.mxu2 %vm769_vm2, %v3146_v32  ;;  %2540 = vmatmul.msk.f32.gmra.mxu3 %vm769_vm2, %v3146_v32  ;;  %v1790_v44 = vld [vmem:[%s4272_s9] sm:$0xff]  ;;  %v970_v59 = vmax.f32 %v3442_v50, 0.0  ;;  %v971_v16 = vmax.f32 %v3445_v51, 0.0 }
 0x164   : > { %1795 = vperm.xlu2 %2633, %v1790_v44  }
 0x166   : > { %v1111_v38 = vpop.f32.mrf.mxu2  ;;  %v1149_v39 = vpop.f32.mrf.mxu3 }
 0x167   : > { %v1112_v18 = vadd.f32 %v1111_v38, %v3435_v56  ;;  %v1150_v27 = vadd.f32 %v1149_v39, %v3439_v57  ;;  %v3584_v28 = vpop.f32.mrf.mxu0  ;;  %v3586_v55 = vpop.f32.mrf.mxu1  ;;  %v3595_v38 = vadd.f32 %v3279_v1, %v3395_v52  ;;  %v3603_v39 = vadd.f32 %v3281_v2, %v3395_v52 }
 0x169   : > { %v1175_v32 = vmax.f32 %v1112_v18, 0.0  ;;  %v1176_v30 = vmax.f32 %v1150_v27, 0.0  ;;  %v910_v1 = vadd.f32 %v3459_v60, %v3595_v38  ;;  %v948_v51 = vadd.f32 %v3461_v61, %v3603_v39 }
 0x16a   : > { %2517 = vmatmul.msk.f32.gmra.mxu0 %vm769_vm2, %v3159_v33  ;;  %2525 = vmatmul.msk.f32.gmra.mxu1 %vm769_vm2, %v3159_v33  ;;  %v3628_v61 = vadd.f32 %v3295_v5, %v3303_v9 }
 0x16b   : > { %v3605_v44 = vadd.f32 %v1175_v32, %v970_v59  ;;  %v3607_v50 = vadd.f32 %v1176_v30, %v971_v16  ;;  %2533 = vmatmul.msk.f32.gmra.mxu2 %vm769_vm2, %v3159_v33  ;;  %2541 = vmatmul.msk.f32.gmra.mxu3 %vm769_vm2, %v3159_v33  ;;  %v1925_v33 = vld [vmem:[%s4273_s10 + $0x8] sm:$0xff]  ;;  %v974_v30 = vmax.f32 %v910_v1, 0.0  ;;  %v975_v60 = vmax.f32 %v948_v51, 0.0 }
 0x16c   : > { %1934 = vperm.xlu2 %2633, %v1925_v33   ;;  %v913_v13 = vadd.f32 %v3475_v41, %v3628_v61  ;;  %v3650_v41 = vadd.f32 %v3313_v10, %v3277_v0 }
 0x16e   : > { %v1114_v18 = vpop.f32.mrf.mxu2  ;;  %v1152_v27 = vpop.f32.mrf.mxu3  ;;  %4316 = vst [vmem:[#allocation35_spill] sm:$0xff] %v3650_v41 }
 0x16f   : > { %v1115_v2 = vadd.f32 %v1114_v18, %v3595_v38  ;;  %v1153_v59 = vadd.f32 %v1152_v27, %v3603_v39  ;;  %v3619_v16 = vpop.f32.mrf.mxu0  ;;  %v3621_v32 = vpop.f32.mrf.mxu1  ;;  %v3632_v18 = vadd.f32 %v3297_v6, %v3303_v9 }
 0x171   : > { %v1179_v36 = vmax.f32 %v1115_v2, 0.0  ;;  %v1180_v19 = vmax.f32 %v1153_v59, 0.0  ;;  %v951_v1 = vadd.f32 %v3477_v40, %v3632_v18  ;;  %v3654_v40 = vadd.f32 %v3315_v11, %v3277_v0 }
 0x173   : > { %v3634_v27 = vadd.f32 %v1179_v36, %v974_v30  ;;  %v3636_v29 = vadd.f32 %v1180_v19, %v975_v60  ;;  %v978_v36 = vmax.f32 %v913_v13, 0.0  ;;  %v979_v30 = vmax.f32 %v951_v1, 0.0  ;;  %4317 = vst [vmem:[#allocation36_spill] sm:$0xff] %v3654_v40 }
 0x174   : > { %v954_v13 = vadd.f32 %v3496_v8, %v3654_v40 }
 0x176   : > { %v1117_v51 = vpop.f32.mrf.mxu2  ;;  %v1155_v2 = vpop.f32.mrf.mxu3 }
 0x177   : > { %v1118_v59 = vadd.f32 %v1117_v51, %v3628_v61  ;;  %v1156_v5 = vadd.f32 %v1155_v2, %v3632_v18  ;;  %v3644_v33 = vpop.f32.mrf.mxu0  ;;  %v3646_v6 = vpop.f32.mrf.mxu1  ;;  %v916_v2 = vadd.f32 %v3494_v24, %v3650_v41 }
 0x178   : > { %4314 = vst [vmem:[#allocation33_spill] sm:$0xff] %v3644_v33 }
 0x179   : > { %4315 = vst [vmem:[#allocation34_spill] sm:$0xff] %v3646_v6  ;;  %v1183_v19 = vmax.f32 %v1118_v59, 0.0  ;;  %v1184_v60 = vmax.f32 %v1156_v5, 0.0 }
 0x17b   : > { %v3656_v54 = vadd.f32 %v1183_v19, %v978_v36  ;;  %v3658_v51 = vadd.f32 %v1184_v60, %v979_v30  ;;  %v982_v36 = vmax.f32 %v916_v2, 0.0  ;;  %v983_v19 = vmax.f32 %v954_v13, 0.0 }
 0x17e   : > { %v1120_v1 = vpop.f32.mrf.mxu2  ;;  %v1158_v59 = vpop.f32.mrf.mxu3 }
 0x17f   : > { %v1121_v5 = vadd.f32 %v1120_v1, %v3650_v41  ;;  %v1159_v10 = vadd.f32 %v1158_v59, %v3654_v40  ;;  %v3666_v6 = vpop.f32.mrf.mxu0  ;;  %v3668_v11 = vpop.f32.mrf.mxu1 }
 0x180   : > { %4318 = vst [vmem:[#allocation37_spill] sm:$0xff] %v3666_v6 }
 0x181   : > { %4319 = vst [vmem:[#allocation38_spill] sm:$0xff] %v3668_v11  ;;  %v1187_v30 = vmax.f32 %v1121_v5, 0.0  ;;  %v1188_v60 = vmax.f32 %v1159_v10, 0.0 }
 0x183   : > { %v3670_v33 = vadd.f32 %v1187_v30, %v982_v36  ;;  %v3672_v24 = vadd.f32 %v1188_v60, %v983_v19 }
 0x186   : > { %v1335_v0 = vpop.f32.mrf.mxu2  ;;  %v1373_v8 = vpop.f32.mrf.mxu3 }
 0x187   : > { %v1336_v14 = vadd.f32 %v1335_v0, %v3339_v21  ;;  %v1374_v1 = vadd.f32 %v1373_v8, %v3343_v22  ;;  %v3676_v12 = vpop.f32.mrf.mxu0  ;;  %v3678_v59 = vpop.f32.mrf.mxu1 }
 0x188   : > { %4320 = vst [vmem:[#allocation39_spill] sm:$0xff] %v3678_v59 }
 0x189   : > { %v1396_v6 = vmax.f32 %v1336_v14, 0.0  ;;  %v1397_v11 = vmax.f32 %v1374_v1, 0.0  ;;  %v3704_v1 = vadd.f32 %v3267_v63, %v3395_v52 }
 0x18b   : > { %v3681_v2 = vadd.f32 %v1396_v6, %v3531_v23  ;;  %v3684_v13 = vadd.f32 %v1397_v11, %v3533_v15  ;;  %v3700_v11 = vadd.f32 %v3265_v62, %v3395_v52  ;;  %v872_v52 = vadd.f32 %v3449_v37, %v3704_v1 }
 0x18c   : > { %v3730_v37 = vadd.f32 %v3283_v3, %v3303_v9 }
 0x18d   : > { %v834_v63 = vadd.f32 %v3447_v26, %v3700_v11 }
 0x18e   : > { %v1338_v5 = vpop.f32.mrf.mxu2  ;;  %v1376_v10 = vpop.f32.mrf.mxu3 }
 0x18f   : > { %v1339_v36 = vadd.f32 %v1338_v5, %v3379_v48  ;;  %v1377_v0 = vadd.f32 %v1376_v10, %v3383_v49  ;;  %v3688_v19 = vpop.f32.mrf.mxu0  ;;  %v3690_v30 = vpop.f32.mrf.mxu1 }
 0x190   : > { %4321 = vst [vmem:[#allocation40_spill] sm:$0xff] %v3688_v19 }
 0x191   : > { %4322 = vst [vmem:[#allocation41_spill] sm:$0xff] %v3690_v30  ;;  %v1400_v60 = vmax.f32 %v1339_v36, 0.0  ;;  %v1401_v8 = vmax.f32 %v1377_v0, 0.0  ;;  %v1077_v0 = vadd.f32 %v3586_v55, %v3704_v1  ;;  %v972_v30 = vmax.f32 %v834_v63, 0.0 }
 0x192   : > { %v973_v55 = vmax.f32 %v872_v52, 0.0 }
 0x193   : > { %v3693_v14 = vadd.f32 %v1400_v60, %v3554_v58  ;;  %v3696_v23 = vadd.f32 %v1401_v8, %v3556_v7  ;;  %v1039_v7 = vadd.f32 %v3584_v28, %v3700_v11 }
 0x196   : > { %v1341_v15 = vpop.f32.mrf.mxu2  ;;  %v1379_v6 = vpop.f32.mrf.mxu3 }
 0x197   : > { %v1342_v5 = vadd.f32 %v1341_v15, %v3407_v53  ;;  %v1380_v10 = vadd.f32 %v1379_v6, %v3411_v25  ;;  %v3708_v36 = vpop.f32.mrf.mxu0  ;;  %v3710_v58 = vpop.f32.mrf.mxu1  ;;  %v1177_v6 = vmax.f32 %v1039_v7, 0.0 }
 0x198   : > { %4323 = vst [vmem:[#allocation42_spill] sm:$0xff] %v3708_v36 }
 0x199   : > { %4324 = vst [vmem:[#allocation43_spill] sm:$0xff] %v3710_v58  ;;  %v1404_v62 = vmax.f32 %v1342_v5, 0.0  ;;  %v1405_v60 = vmax.f32 %v1380_v10, 0.0  ;;  %v1178_v58 = vmax.f32 %v1077_v0, 0.0  ;;  %v1205_v0 = vadd.f32 %v1177_v6, %v972_v30 }
 0x19b   : > { %v3721_v8 = vadd.f32 %v1404_v62, %v3574_v31  ;;  %v3724_v15 = vadd.f32 %v1405_v60, %v3576_v17  ;;  %v3734_v31 = vadd.f32 %v3285_v4, %v3303_v9  ;;  %v1206_v62 = vadd.f32 %v1178_v58, %v973_v55 }
 0x19c   : > { %v837_v9 = vadd.f32 %v3463_v46, %v3730_v37 }
 0x19d   : > { %v1080_v52 = vadd.f32 %v3621_v32, %v3734_v31 }
 0x19e   : > { %v1344_v28 = vpop.f32.mrf.mxu2  ;;  %v1382_v36 = vpop.f32.mrf.mxu3 }
 0x19f   : > { %v1345_v5 = vadd.f32 %v1344_v28, %v3435_v56  ;;  %v1383_v10 = vadd.f32 %v1382_v36, %v3439_v57  ;;  %v1271_v26 = vpop.f32.mrf.mxu0  ;;  %v1309_v19 = vpop.f32.mrf.mxu1  ;;  %v1042_v36 = vadd.f32 %v3619_v16, %v3730_v37  ;;  %v1182_v32 = vmax.f32 %v1080_v52, 0.0 }
 0x1a0   : > { %v1272_v17 = vadd.f32 %v1271_v26, %v3700_v11  ;;  %v1310_v7 = vadd.f32 %v1309_v19, %v3704_v1  ;;  %v875_v19 = vadd.f32 %v3465_v47, %v3734_v31  ;;  %v976_v26 = vmax.f32 %v837_v9, 0.0 }
 0x1a1   : > { %v1408_v60 = vmax.f32 %v1345_v5, 0.0  ;;  %v1409_v63 = vmax.f32 %v1383_v10, 0.0  ;;  %v1181_v58 = vmax.f32 %v1042_v36, 0.0 }
 0x1a2   : > { %v1410_v3 = vmax.f32 %v1272_v17, 0.0  ;;  %v1411_v28 = vmax.f32 %v1310_v7, 0.0  ;;  %v977_v17 = vmax.f32 %v875_v19, 0.0 }
 0x1a3   : > { %v3743_v59 = vadd.f32 %v1408_v60, %v3605_v44  ;;  %v3746_v4 = vadd.f32 %v1409_v63, %v3607_v50 }
 0x1a4   : > { %v3752_v30 = vadd.f32 %v1410_v3, %v1205_v0  ;;  %v3754_v16 = vadd.f32 %v1411_v28, %v1206_v62  ;;  %v1209_v62 = vadd.f32 %v1181_v58, %v976_v26  ;;  %v1210_v60 = vadd.f32 %v1182_v32, %v977_v17 }
 0x1a6   : > { %4325 = vst [vmem:[#allocation44_spill] sm:$0xff] %v3752_v30  ;;  %v1347_v6 = vpop.f32.mrf.mxu2  ;;  %v1385_v55 = vpop.f32.mrf.mxu3 }
 0x1a7   : > { %4326 = vst [vmem:[#allocation45_spill] sm:$0xff] %v3754_v16  ;;  %v1348_v44 = vadd.f32 %v1347_v6, %v3595_v38  ;;  %v1386_v5 = vadd.f32 %v1385_v55, %v3603_v39  ;;  %v1274_v50 = vpop.f32.mrf.mxu0  ;;  %v1312_v10 = vpop.f32.mrf.mxu1 }
 0x1a8   : > { %v1275_v46 = vadd.f32 %v1274_v50, %v3730_v37  ;;  %v1313_v47 = vadd.f32 %v1312_v10, %v3734_v31 }
 0x1a9   : > { %v1412_v7 = vmax.f32 %v1348_v44, 0.0  ;;  %v1413_v0 = vmax.f32 %v1386_v5, 0.0 }
 0x1aa   : > { %v1414_v63 = vmax.f32 %v1275_v46, 0.0  ;;  %v1415_v36 = vmax.f32 %v1313_v47, 0.0 }
 0x1ab   : > { %v3761_v52 = vadd.f32 %v1412_v7, %v3634_v27  ;;  %v3764_v3 = vadd.f32 %v1413_v0, %v3636_v29 }
 0x1ac   : > { %v3766_v28 = vadd.f32 %v1414_v63, %v1209_v62  ;;  %v3768_v9 = vadd.f32 %v1415_v36, %v1210_v60 }
 0x1ae   : > { %4327 = vst [vmem:[#allocation46_spill] sm:$0xff] %v3766_v28  ;;  %v1350_v19 = vpop.f32.mrf.mxu2  ;;  %v1388_v6 = vpop.f32.mrf.mxu3 }
 0x1af   : > { %4328 = vst [vmem:[#allocation47_spill] sm:$0xff] %v3768_v9  ;;  %v1351_v55 = vadd.f32 %v1350_v19, %v3628_v61  ;;  %v1389_v44 = vadd.f32 %v1388_v6, %v3632_v18  ;;  %v3772_v58 = vpop.f32.mrf.mxu0  ;;  %v3774_v32 = vpop.f32.mrf.mxu1 }
 0x1b1   : > { %v1416_v5 = vmax.f32 %v1351_v55, 0.0  ;;  %v1417_v27 = vmax.f32 %v1389_v44, 0.0 }
 0x1b3   : > { %v3777_v50 = vadd.f32 %v1416_v5, %v3656_v54  ;;  %v3780_v29 = vadd.f32 %v1417_v27, %v3658_v51 }
 0x1b5   : > { %4329 = vst [vmem:[#allocation48_spill] sm:$0xff] %v3777_v50 }
 0x1b6   : > { %4330 = vst [vmem:[#allocation49_spill] sm:$0xff] %v3780_v29  ;;  %v1353_v10 = vpop.f32.mrf.mxu2  ;;  %v1391_v26 = vpop.f32.mrf.mxu3 }
 0x1b7   : > { %v1354_v17 = vadd.f32 %v1353_v10, %v3650_v41  ;;  %v1392_v46 = vadd.f32 %v1391_v26, %v3654_v40  ;;  %v3784_v47 = vpop.f32.mrf.mxu0  ;;  %v3786_v7 = vpop.f32.mrf.mxu1 }
 0x1b8   : > { %4331 = vst [vmem:[#allocation50_spill] sm:$0xff] %v3784_v47 }
 0x1b9   : > { %4332 = vst [vmem:[#allocation51_spill] sm:$0xff] %v3786_v7  ;;  %v1420_v0 = vmax.f32 %v1354_v17, 0.0  ;;  %v1421_v62 = vmax.f32 %v1392_v46, 0.0 }
 0x1bb   : > { %v3789_v60 = vadd.f32 %v1420_v0, %v3670_v33  ;;  %v3792_v54 = vadd.f32 %v1421_v62, %v3672_v24 }
 0x1bd   : > { %4333 = vst [vmem:[#allocation52_spill] sm:$0xff] %v3789_v60 }
 0x1be   : > { %4334 = vst [vmem:[#allocation53_spill] sm:$0xff] %v3792_v54  ;;  %v1568_v51 = vpop.f32.mrf.mxu2  ;;  %v1606_v63 = vpop.f32.mrf.mxu3 }
 0x1bf   : > { %v1569_v36 = vadd.f32 %v1568_v51, %v3339_v21  ;;  %v1607_v19 = vadd.f32 %v1606_v63, %v3343_v22  ;;  %v3796_v6 = vpop.f32.mrf.mxu0  ;;  %v3798_v55 = vpop.f32.mrf.mxu1  ;;  %v3832_v51 = vadd.f32 %v3211_v43, %v3365_v45 }
 0x1c0   : > { %4335 = vst [vmem:[#allocation54_spill] sm:$0xff] %v3796_v6 }
 0x1c1   : > { %4336 = vst [vmem:[#allocation55_spill] sm:$0xff] %v3798_v55  ;;  %v1629_v44 = vmax.f32 %v1569_v36, 0.0  ;;  %v1630_v5 = vmax.f32 %v1607_v19, 0.0  ;;  %v4344_v19 = vld [vmem:[#allocation6_spill] sm:$0xff] }
 0x1c3   : > { %v3801_v27 = vadd.f32 %v1629_v44, %v3681_v2  ;;  %v3804_v33 = vadd.f32 %v1630_v5, %v3684_v13  ;;  %v3820_v13 = vadd.f32 %v3185_v34, %v3325_v20  ;;  %v4343_v34 = vld [vmem:[#allocation15_spill] sm:$0xff] }
 0x1c4   : > { %v3840_v44 = vadd.f32 %v4344_v19, %v4343_v34  ;;  %v4352_v19 = vld [vmem:[#allocation18_spill] sm:$0xff] }
 0x1c5   : > { %4337 = vst [vmem:[#allocation56_spill] sm:$0xff] %v3801_v27  ;;  %v4354_v27 = vld [vmem:[#allocation11_spill] sm:$0xff] }
 0x1c6   : > { %4338 = vst [vmem:[#allocation57_spill] sm:$0xff] %v3804_v33  ;;  %v1571_v24 = vpop.f32.mrf.mxu2  ;;  %v1609_v10 = vpop.f32.mrf.mxu3 }
 0x1c7   : > { %v1572_v26 = vadd.f32 %v1571_v24, %v3379_v48  ;;  %v1610_v21 = vadd.f32 %v1609_v10, %v3383_v49  ;;  %v3808_v17 = vpop.f32.mrf.mxu0  ;;  %v3810_v22 = vpop.f32.mrf.mxu1  ;;  %v3824_v48 = vadd.f32 %v3187_v35, %v3325_v20  ;;  %v3828_v49 = vadd.f32 %v3209_v42, %v3365_v45  ;;  %v4345_v35 = vld [vmem:[#allocation14_spill] sm:$0xff]  ;;  %v4346_v45 = vld [vmem:[#allocation7_spill] sm:$0xff] }
 0x1c8   : > { %4339 = vst [vmem:[#allocation58_spill] sm:$0xff] %v3810_v22  ;;  %v3852_v10 = vadd.f32 %v4346_v45, %v4343_v34  ;;  %v4353_v45 = vld [vmem:[#allocation10_spill] sm:$0xff] }
 0x1c9   : > { %v1633_v46 = vmax.f32 %v1572_v26, 0.0  ;;  %v1634_v0 = vmax.f32 %v1610_v21, 0.0  ;;  %v860_v20 = vadd.f32 %v4345_v35, %v3824_v48  ;;  %v4347_v26 = vld [vmem:[#allocation22_spill] sm:$0xff]  ;;  %v4348_v21 = vld [vmem:[#allocation8_spill] sm:$0xff]  ;;  %v828_v35 = vadd.f32 %v4352_v19, %v3840_v44 }
 0x1cb   : > { %v3813_v62 = vadd.f32 %v1633_v46, %v3693_v14  ;;  %v3816_v2 = vadd.f32 %v1634_v0, %v3696_v23  ;;  %v4342_v14 = vld [vmem:[#allocation13_spill] sm:$0xff]  ;;  %v3856_v46 = vadd.f32 %v4348_v21, %v4347_v26  ;;  %v4355_v21 = vld [vmem:[#allocation12_spill] sm:$0xff]  ;;  %v957_v54 = vmax.f32 %v860_v20, 0.0 }
 0x1cc   : > { %v3836_v23 = vadd.f32 %v4342_v14, %v3820_v13  ;;  %v4349_v0 = vld [vmem:[#allocation9_spill] sm:$0xff]  ;;  %v964_v40 = vmax.f32 %v828_v35, 0.0 }
 0x1cd   : > { %4340 = vst [vmem:[#allocation59_spill] sm:$0xff] %v3813_v62  ;;  %v3860_v14 = vadd.f32 %v4349_v0, %v4347_v26  ;;  %v3874_v62 = vadd.f32 %v4355_v21, %v4353_v45  ;;  %v4356_v0 = vld [vmem:[#allocation19_spill] sm:$0xff]  ;;  %v4363_v20 = vld [vmem:[#allocation29_spill] sm:$0xff] }
 0x1ce   : > { %4341 = vst [vmem:[#allocation60_spill] sm:$0xff] %v3816_v2  ;;  %v1574_v63 = vpop.f32.mrf.mxu2  ;;  %v1612_v36 = vpop.f32.mrf.mxu3  ;;  %v3870_v2 = vadd.f32 %v4354_v27, %v4353_v45  ;;  %v956_v26 = vmax.f32 %v3836_v23, 0.0  ;;  %v4360_v27 = vld [vmem:[#allocation26_spill] sm:$0xff]  ;;  %v4361_v45 = vld [vmem:[#allocation27_spill] sm:$0xff]  ;;  %v4362_v23 = vld [vmem:[#allocation28_spill] sm:$0xff] }
 0x1cf   : > { %v1575_v42 = vadd.f32 %v1574_v63, %v3407_v53  ;;  %v1613_v5 = vadd.f32 %v1612_v36, %v3411_v25  ;;  %v3846_v24 = vpop.f32.mrf.mxu0  ;;  %v3848_v43 = vpop.f32.mrf.mxu1  ;;  %v4350_v53 = vld [vmem:[#allocation16_spill] sm:$0xff]  ;;  %v4351_v25 = vld [vmem:[#allocation17_spill] sm:$0xff]  ;;  %v1065_v19 = vadd.f32 %v4360_v27, %v3824_v48  ;;  %v1030_v21 = vadd.f32 %v4361_v45, %v3828_v49  ;;  %v4367_v45 = vld [vmem:[#allocation23_spill] sm:$0xff] }
 0x1d0   : > { %v825_v63 = vadd.f32 %v4350_v53, %v3828_v49  ;;  %v863_v36 = vadd.f32 %v4351_v25, %v3832_v51  ;;  %v866_v53 = vadd.f32 %v4356_v0, %v3852_v10  ;;  %v4357_v25 = vld [vmem:[#allocation25_spill] sm:$0xff]  ;;  %v1068_v16 = vadd.f32 %v4362_v23, %v3832_v51 }
 0x1d1   : > { %v1637_v33 = vmax.f32 %v1575_v42, 0.0  ;;  %v1638_v34 = vmax.f32 %v1613_v5, 0.0  ;;  %v1027_v60 = vadd.f32 %v4357_v25, %v3820_v13  ;;  %v1033_v0 = vadd.f32 %v4363_v20, %v3840_v44  ;;  %v4366_v27 = vld [vmem:[#allocation21_spill] sm:$0xff]  ;;  %v4368_v20 = vld [vmem:[#allocation24_spill] sm:$0xff] }
 0x1d2   : > { %v960_v30 = vmax.f32 %v825_v63, 0.0  ;;  %v961_v25 = vmax.f32 %v863_v36, 0.0  ;;  %v840_v41 = vadd.f32 %v4367_v45, %v3870_v2  ;;  %v878_v63 = vadd.f32 %v4368_v20, %v3874_v62  ;;  %v4369_v45 = vld [vmem:[#allocation31_spill] sm:$0xff] }
 0x1d3   : > { %v3882_v42 = vadd.f32 %v1637_v33, %v3721_v8  ;;  %v3885_v5 = vadd.f32 %v1638_v34, %v3724_v15  ;;  %v4364_v8 = vld [vmem:[#allocation30_spill] sm:$0xff]  ;;  %v965_v15 = vmax.f32 %v866_v53, 0.0  ;;  %v4365_v34 = vld [vmem:[#allocation20_spill] sm:$0xff]  ;;  %v1161_v36 = vmax.f32 %v1027_v60, 0.0 }
 0x1d4   : > { %v1071_v33 = vadd.f32 %v4364_v8, %v3852_v10  ;;  %v1165_v9 = vmax.f32 %v1030_v21, 0.0  ;;  %v1169_v28 = vmax.f32 %v1033_v0, 0.0  ;;  %v1036_v6 = vadd.f32 %v4369_v45, %v3856_v46  ;;  %v4370_v60 = vld [vmem:[#allocation32_spill] sm:$0xff] }
 0x1d5   : > { %4358 = vst [vmem:[#allocation13_spill] sm:$0xff] %v3882_v42  ;;  %v869_v42 = vadd.f32 %v4366_v27, %v3860_v14  ;;  %v1166_v27 = vmax.f32 %v1068_v16, 0.0  ;;  %v980_v21 = vmax.f32 %v840_v41, 0.0 }
 0x1d6   : > { %4359 = vst [vmem:[#allocation15_spill] sm:$0xff] %v3885_v5  ;;  %v831_v5 = vadd.f32 %v4365_v34, %v3856_v46  ;;  %v1577_v23 = vpop.f32.mrf.mxu2  ;;  %v1615_v7 = vpop.f32.mrf.mxu3  ;;  %v1162_v34 = vmax.f32 %v1065_v19, 0.0  ;;  %v1170_v55 = vmax.f32 %v1071_v33, 0.0  ;;  %v981_v33 = vmax.f32 %v878_v63, 0.0 }
 0x1d7   : > { %v1578_v35 = vadd.f32 %v1577_v23, %v3435_v56  ;;  %v1616_v8 = vadd.f32 %v1615_v7, %v3439_v57  ;;  %v3907_v53 = vpop.f32.mrf.mxu0  ;;  %v3909_v47 = vpop.f32.mrf.mxu1  ;;  %v1074_v56 = vadd.f32 %v4370_v60, %v3860_v14  ;;  %v4371_v57 = vld [vmem:[#allocation33_spill] sm:$0xff]  ;;  %v4372_v23 = vld [vmem:[#allocation34_spill] sm:$0xff]  ;;  %v969_v19 = vmax.f32 %v869_v42, 0.0 }
 0x1d8   : > { %v968_v20 = vmax.f32 %v831_v5, 0.0  ;;  %v1045_v7 = vadd.f32 %v4371_v57, %v3870_v2  ;;  %v1083_v22 = vadd.f32 %v4372_v23, %v3874_v62  ;;  %v3927_v5 = vadd.f32 %v1162_v34, %v957_v54  ;;  %v4375_v54 = vld [vmem:[#allocation37_spill] sm:$0xff]  ;;  %v4380_v34 = vld [vmem:[#allocation42_spill] sm:$0xff] }
 0x1d9   : > { %v1641_v29 = vmax.f32 %v1578_v35, 0.0  ;;  %v1642_v50 = vmax.f32 %v1616_v8, 0.0  ;;  %v3925_v35 = vadd.f32 %v1161_v36, %v956_v26  ;;  %v3929_v8 = vadd.f32 %v1165_v9, %v960_v30 }
 0x1da   : > { %v3931_v45 = vadd.f32 %v1166_v27, %v961_v25  ;;  %v3933_v60 = vadd.f32 %v1169_v28, %v964_v40  ;;  %v3935_v57 = vadd.f32 %v1170_v55, %v965_v15  ;;  %v1173_v41 = vmax.f32 %v1036_v6, 0.0  ;;  %v4376_v55 = vld [vmem:[#allocation38_spill] sm:$0xff]  ;;  %v4377_v25 = vld [vmem:[#allocation39_spill] sm:$0xff] }
 0x1db   : > { %v3920_v16 = vadd.f32 %v1641_v29, %v3743_v59  ;;  %v3923_v0 = vadd.f32 %v1642_v50, %v3746_v4  ;;  %v1174_v42 = vmax.f32 %v1074_v56, 0.0  ;;  %v1185_v59 = vmax.f32 %v1045_v7, 0.0 }
 0x1dc   : > { %v1186_v29 = vmax.f32 %v1083_v22, 0.0  ;;  %v1278_v4 = vadd.f32 %v3772_v58, %v3870_v2  ;;  %v3941_v63 = vadd.f32 %v4375_v54, %v3820_v13  ;;  %v1316_v30 = vadd.f32 %v3774_v32, %v3874_v62  ;;  %v4378_v32 = vld [vmem:[#allocation40_spill] sm:$0xff] }
 0x1dd   : > { %4373 = vst [vmem:[#allocation6_spill] sm:$0xff] %v3920_v16  ;;  %v3949_v22 = vadd.f32 %v4376_v55, %v3824_v48  ;;  %v3953_v58 = vadd.f32 %v3676_v12, %v3828_v49  ;;  %v3957_v15 = vadd.f32 %v4377_v25, %v3832_v51  ;;  %v3961_v36 = vadd.f32 %v4378_v32, %v3840_v44 }
 0x1de   : > { %4374 = vst [vmem:[#allocation14_spill] sm:$0xff] %v3923_v0  ;;  %v1580_v50 = vpop.f32.mrf.mxu2  ;;  %v1618_v26 = vpop.f32.mrf.mxu3  ;;  %v1269_v27 = vadd.f32 %v4380_v34, %v3856_v46  ;;  %v1201_v23 = vadd.f32 %v1173_v41, %v968_v20  ;;  %v1202_v12 = vadd.f32 %v1174_v42, %v969_v19  ;;  %v1418_v54 = vmax.f32 %v1278_v4, 0.0 }
 0x1df   : > { %v1581_v40 = vadd.f32 %v1580_v50, %v3595_v38  ;;  %v1619_v28 = vadd.f32 %v1618_v26, %v3603_v39  ;;  %v1507_v9 = vpop.f32.mrf.mxu0  ;;  %v1545_v6 = vpop.f32.mrf.mxu1  ;;  %v4379_v38 = vld [vmem:[#allocation41_spill] sm:$0xff]  ;;  %v4381_v50 = vld [vmem:[#allocation43_spill] sm:$0xff]  ;;  %v1213_v55 = vadd.f32 %v1185_v59, %v980_v21  ;;  %v1419_v25 = vmax.f32 %v1316_v30, 0.0 }
 0x1e0   : > { %v3965_v39 = vadd.f32 %v4379_v38, %v3852_v10  ;;  %v1307_v26 = vadd.f32 %v4381_v50, %v3860_v14  ;;  %v1214_v38 = vadd.f32 %v1186_v29, %v981_v33  ;;  %v1394_v16 = vmax.f32 %v3941_v63, 0.0  ;;  %v4399_v63 = vld [vmem:[#allocation13_spill] sm:$0xff] }
 0x1e1   : > { %v1645_v56 = vmax.f32 %v1581_v40, 0.0  ;;  %v1646_v7 = vmax.f32 %v1619_v28, 0.0  ;;  %v1395_v40 = vmax.f32 %v3949_v22, 0.0  ;;  %v1398_v20 = vmax.f32 %v3953_v58, 0.0  ;;  %v4400_v22 = vld [vmem:[#allocation15_spill] sm:$0xff] }
 0x1e2   : > { %v1399_v19 = vmax.f32 %v3957_v15, 0.0  ;;  %v1402_v41 = vmax.f32 %v3961_v36, 0.0  ;;  %v1403_v21 = vmax.f32 %v3965_v39, 0.0  ;;  %v1406_v42 = vmax.f32 %v1269_v27, 0.0 }
 0x1e3   : > { %v3972_v32 = vadd.f32 %v1645_v56, %v3761_v52  ;;  %v3975_v0 = vadd.f32 %v1646_v7, %v3764_v3  ;;  %v1407_v59 = vmax.f32 %v1307_v26, 0.0  ;;  %v1446_v52 = vadd.f32 %v1418_v54, %v1213_v55 }
 0x1e4   : > { %v1508_v4 = vadd.f32 %v1507_v9, %v3730_v37  ;;  %v1546_v3 = vadd.f32 %v1545_v6, %v3734_v31  ;;  %v1447_v30 = vadd.f32 %v1419_v25, %v1214_v38  ;;  %v3987_v28 = vadd.f32 %v3808_v17, %v3840_v44 }
 0x1e5   : > { %v1505_v27 = vadd.f32 %v3907_v53, %v3700_v11  ;;  %v1543_v37 = vadd.f32 %v3909_v47, %v3704_v1  ;;  %v1502_v17 = vadd.f32 %v3846_v24, %v3856_v46  ;;  %v4382_v11 = vld [vmem:[#allocation58_spill] sm:$0xff]  ;;  %v4383_v1 = vld [vmem:[#allocation48_spill] sm:$0xff]  ;;  %v1434_v25 = vadd.f32 %v1406_v42, %v1201_v23 }
 0x1e6   : > { %v1583_v33 = vpop.f32.mrf.mxu2  ;;  %v1621_v29 = vpop.f32.mrf.mxu3  ;;  %v1647_v6 = vmax.f32 %v1508_v4, 0.0  ;;  %v1648_v7 = vmax.f32 %v1546_v3, 0.0  ;;  %v1537_v53 = vadd.f32 %v4382_v11, %v3852_v10  ;;  %v4386_v4 = vld [vmem:[#allocation55_spill] sm:$0xff]  ;;  %v4387_v10 = vld [vmem:[#allocation46_spill] sm:$0xff] }
 0x1e7   : > { %v1584_v34 = vadd.f32 %v1583_v33, %v3628_v61  ;;  %v1622_v36 = vadd.f32 %v1621_v29, %v3632_v18  ;;  %v1510_v56 = vpop.f32.mrf.mxu0  ;;  %v1548_v39 = vpop.f32.mrf.mxu1  ;;  %v1540_v61 = vadd.f32 %v3848_v43, %v3860_v14  ;;  %v1644_v55 = vmax.f32 %v1543_v37, 0.0  ;;  %v4385_v14 = vld [vmem:[#allocation54_spill] sm:$0xff] }
 0x1e8   : > { %v1511_v31 = vadd.f32 %v1510_v56, %v3870_v2  ;;  %v1549_v9 = vadd.f32 %v1548_v39, %v3874_v62  ;;  %v4384_v2 = vld [vmem:[#allocation49_spill] sm:$0xff]  ;;  %v1643_v62 = vmax.f32 %v1505_v27, 0.0  ;;  %v1435_v43 = vadd.f32 %v1407_v59, %v1202_v12  ;;  %v4389_v23 = vld [vmem:[#allocation50_spill] sm:$0xff]  ;;  %v4391_v59 = vld [vmem:[#allocation35_spill] sm:$0xff] }
 0x1e9   : > { %v1649_v44 = vmax.f32 %v1584_v34, 0.0  ;;  %v1650_v18 = vmax.f32 %v1622_v36, 0.0  ;;  %v1496_v38 = vadd.f32 %v4385_v14, %v3828_v49  ;;  %v1534_v3 = vadd.f32 %v4386_v4, %v3832_v51  ;;  %v4388_v36 = vld [vmem:[#allocation47_spill] sm:$0xff]  ;;  %v1787_v14 = vld [vmem:[%s4270_s7] sm:$0xff] }
 0x1ea   : > { %v1651_v50 = vmax.f32 %v1511_v31, 0.0  ;;  %v1652_v26 = vmax.f32 %v1549_v9, 0.0  ;;  %v1639_v33 = vmax.f32 %v1502_v17, 0.0  ;;  %v1640_v29 = vmax.f32 %v1540_v61, 0.0  ;;  %v4390_v49 = vld [vmem:[#allocation51_spill] sm:$0xff]  ;;  %v4393_v9 = vld [vmem:[#allocation44_spill] sm:$0xff] }
 0x1eb   : > { %v1677_v47 = vadd.f32 %v1649_v44, %v4383_v1  ;;  %v1678_v54 = vadd.f32 %v1650_v18, %v4384_v2  ;;  %v1675_v34 = vadd.f32 %v1647_v6, %v4387_v10  ;;  %v1676_v56 = vadd.f32 %v1648_v7, %v4388_v36  ;;  %v4394_v61 = vld [vmem:[#allocation45_spill] sm:$0xff]  ;;  %v4395_v1 = vld [vmem:[#allocation52_spill] sm:$0xff]  ;;  %v4063_v4 = vld [vmem:[%s2967_s13 + $0x8] sm:$0xff] }
 0x1ec   : > { %v1679_v24 = vadd.f32 %v1651_v50, %v1446_v52  ;;  %v1680_v46 = vadd.f32 %v1652_v26, %v1447_v30  ;;  %v1493_v12 = vadd.f32 %v4389_v23, %v3820_v13  ;;  %v1531_v42 = vadd.f32 %v4390_v49, %v3824_v48  ;;  %v4392_v52 = vld [vmem:[#allocation36_spill] sm:$0xff]  ;;  %v1922_v23 = vld [vmem:[%s4271_s8 + $0x8] sm:$0xff] }
 0x1ed   : > { %v1635_v27 = vmax.f32 %v3987_v28, 0.0  ;;  %v1636_v37 = vmax.f32 %v1537_v53, 0.0  ;;  %v1671_v17 = vadd.f32 %v1643_v62, %v4393_v9  ;;  %v1672_v44 = vadd.f32 %v1644_v55, %v4394_v61  ;;  %v1789_v36 = vld [vmem:[%s4270_s7 + $0x10] sm:$0xff]  ;;  %v1796_v9 = vpop.permute.xlu2 %1795 }
 0x1ee   : > { %v1586_v39 = vpop.f32.mrf.mxu2  ;;  %v1624_v31 = vpop.f32.mrf.mxu3  ;;  %2542 = vmatpush.msk.msrb.mxu0 %vm1694_vm3, %v1679_v24  ;;  %2544 = vmatpush.msk.msrb.mxu1 %vm1694_vm3, %v1680_v46  ;;  %v1430_v18 = vadd.f32 %v1402_v41, %v3933_v60  ;;  %v1431_v13 = vadd.f32 %v1403_v21, %v3935_v57  ;;  %v1631_v48 = vmax.f32 %v1496_v38, 0.0  ;;  %v1632_v50 = vmax.f32 %v1534_v3, 0.0  ;;  %v4396_v41 = vld [vmem:[#allocation53_spill] sm:$0xff]  ;;  %v4059_v38 = vld [vmem:[%s2967_s13] sm:$0xff]  ;;  %v1788_v3 = vld [vmem:[%s4270_s7 + $0x8] sm:$0xff] }
 0x1ef   : > { %v1587_v51 = vadd.f32 %v1586_v39, %v4391_v59  ;;  %v1625_v30 = vadd.f32 %v1624_v31, %v4392_v52  ;;  %v1667_v26 = vadd.f32 %v1639_v33, %v1434_v25  ;;  %v1668_v11 = vadd.f32 %v1640_v29, %v1435_v43  ;;  %v4081_v39 = vld [vmem:[%s2967_s13 + $0x18] sm:$0xff]  ;;  %v1921_v31 = vld [vmem:[%s4271_s8] sm:$0xff] }
 0x1f0   : > { %1717 = vmatpush.msrb.mxu0 %v1675_v34  ;;  %1737 = vmatpush.msrb.mxu1 %v1676_v56  ;;  %v1426_v28 = vadd.f32 %v1398_v20, %v3929_v8  ;;  %v1427_v53 = vadd.f32 %v1399_v19, %v3931_v45  ;;  %v1627_v21 = vmax.f32 %v1493_v12, 0.0  ;;  %v1628_v2 = vmax.f32 %v1531_v42, 0.0  ;;  %v4404_v19 = vld [vmem:[#allocation57_spill] sm:$0xff]  ;;  %v4077_v56 = vld [vmem:[%s2967_s13 + $0x10] sm:$0xff]  ;;  %s2263_s13 = sshll.u32 %s2259_s25, 4  ;;  %s2264_s13 = int_to_ptr.hbm [resolvable:$true] %s2263_s13 }
 0x1f1   : > { %v1653_v6 = vmax.f32 %v1587_v51, 0.0  ;;  %v1654_v7 = vmax.f32 %v1625_v30, 0.0  ;;  %v1663_v62 = vadd.f32 %v1635_v27, %v1430_v18  ;;  %v1664_v55 = vadd.f32 %v1636_v37, %v1431_v13  ;;  %v1923_v12 = vld [vmem:[%s4271_s8 + $0x10] sm:$0xff]  ;;  %s2692_s0 = sshra.s32 %s2264_s13, 4  ;;  %s2693_s0 = int_to_ptr.hbm [resolvable:$true] %s2692_s0 }
 0x1f2   : > { %1718 = vmatpush.msrb.mxu0 %v1671_v17  ;;  %1738 = vmatpush.msrb.mxu1 %v1672_v44  ;;  %v1422_v24 = vadd.f32 %v1394_v16, %v3925_v35  ;;  %v1423_v8 = vadd.f32 %v1395_v40, %v3927_v5  ;;  %v1659_v45 = vadd.f32 %v1631_v48, %v1426_v28  ;;  %v1683_v16 = vld [vmem:[%s4268_s5] sm:$0xff]  ;;  %v4403_v40 = vld [vmem:[#allocation56_spill] sm:$0xff]  ;;  %v1930_v17 = vpop.permute.xlu0 %1929  ;;  %s2694_s30 = scalar_lea.hbm %s2693_s0, 32  ;;  %p2699_p3 = scmp.lt.s32.totalorder %s2693_s0, %s4274_s11 }
 0x1f3   : > { %v1681_v60 = vadd.f32 %v1653_v6, %v4395_v1  ;;  %v1682_v57 = vadd.f32 %v1654_v7, %v4396_v41  ;;  %v1660_v58 = vadd.f32 %v1632_v50, %v1427_v53  ;;  %v4397_v35 = vld [vmem:[#allocation6_spill] sm:$0xff]  ;;  %p2695_p0 = scmp.ne.s32.totalorder %s2693_s0, %s2694_s30  ;;  %p2700_p4 = scmp.lt.s32.totalorder %s2698_s16, %s2694_s30 }
 0x1f4   : > { %1719 = vmatpush.msrb.mxu0 %v1667_v26  ;;  %1739 = vmatpush.msrb.mxu1 %v1668_v11  ;;  %v1655_v15 = vadd.f32 %v1627_v21, %v1422_v24  ;;  %v1656_v20 = vadd.f32 %v1628_v2, %v1423_v8  ;;  %v4398_v5 = vld [vmem:[#allocation14_spill] sm:$0xff] }
 0x1f5   : > { %2546 = vmatpush.msk.msrb.mxu2 %vm1694_vm3, %v1681_v60  ;;  %2548 = vmatpush.msk.msrb.mxu3 %vm1694_vm3, %v1682_v57  ;;  %v4111_v60 = vpop.permute.xlu2 %1934  ;;  %p2696_p1 = pnand %p2695_p0, %p2842_p6  ;;  %p2701_p5 = por %p2700_p4, %p2699_p3 }
 0x1f6   : > { %1720 = vmatpush.msrb.mxu0 %v1663_v62  ;;  %1740 = vmatpush.msrb.mxu1 %v1664_v55 }
 0x1f7   : > { %1757 = vmatpush.msrb.mxu2 %v1677_v47  ;;  %1777 = vmatpush.msrb.mxu3 %v1678_v54  ;;  %v1688_v47 = vpop.permute.xlu1 %1687  ;;  %p2697_p2 = pneg %p2696_p1 }
 0x1f8   : > { %1721 = vmatpush.msrb.mxu0 %v1659_v45  ;;  %1741 = vmatpush.msrb.mxu1 %v1660_v58 }
 0x1f9   : > { %1758 = vmatpush.msrb.mxu2 %v3972_v32  ;;  %1778 = vmatpush.msrb.mxu3 %v3975_v0  ;;  %v4401_v32 = vld [vmem:[#allocation59_spill] sm:$0xff]  ;;  %v4402_v0 = vld [vmem:[#allocation60_spill] sm:$0xff]  ;;  %p2702_p7 = pnand %p2701_p5, %p2697_p2 }
 0x1fa   : > { %1722 = vmatpush.msrb.mxu0 %v1655_v15  ;;  %1742 = vmatpush.msrb.mxu1 %v1656_v20 }
 0x1fb   : > { %1759 = vmatpush.msrb.mxu2 %v4397_v35  ;;  %1779 = vmatpush.msrb.mxu3 %v4398_v5 }
 0x1fc   : > { %2543 = vmatmul.msk.f32.vlgmr.msrb.gmra.mxu0 %vm1690_vm4, %v1683_v16  ;;  %2545 = vmatmul.msk.f32.vlgmr.msrb.gmra.mxu1 %vm1690_vm4, %v1683_v16 }
 0x1fd   : > { %1760 = vmatpush.msrb.mxu2 %v4399_v63  ;;  %1780 = vmatpush.msrb.mxu3 %v4400_v22 }
 0x1ff   : > { %1761 = vmatpush.msrb.mxu2 %v4401_v32  ;;  %1781 = vmatpush.msrb.mxu3 %v4402_v0  ;;  %v1801_v1 = vpop.permute.xlu1 %1800 }
 0x201   : > { %1762 = vmatpush.msrb.mxu2 %v4403_v40  ;;  %1782 = vmatpush.msrb.mxu3 %v4404_v19 }
 0x202   : > { %2547 = vmatmul.msk.f32.vlgmr.msrb.gmra.mxu2 %vm1690_vm4, %v1683_v16  ;;  %2549 = vmatmul.msk.f32.vlgmr.msrb.gmra.mxu3 %vm1690_vm4, %v1683_v16 }
 0x279   : > { %v1724_v54 = vpop.f32.mrf.mxu0  ;;  %v1744_v46 = vpop.f32.mrf.mxu1 }
 0x27a   : > { %v1725_v25 = vadd.f32 %v1724_v54, %v1688_v47  ;;  %v1745_v43 = vadd.f32 %v1744_v46, %v1688_v47  ;;  %v4122_v54 = vpop.permute.xlu1 %1805 }
 0x27c   : > { %1832 = vmatpush.msra.mxu0 %v1725_v25  ;;  %1858 = vmatpush.msra.mxu1 %v1745_v43 }
 0x27d   : > { %2550 = vmatmul.msk.f32.vlgmr.msra.gmra.mxu0 %vm576_vm0, %v1787_v14  ;;  %2553 = vmatmul.msk.f32.vlgmr.msra.gmra.mxu1 %vm576_vm0, %v1787_v14 }
 0x27e   : > { %1966 = vmatpush.msrb.mxu0 %v4059_v38  ;;  %1992 = vmatpush.msrb.mxu1 %v4063_v4 }
 0x285   : > { %v1764_v33 = vpop.f32.mrf.mxu2  ;;  %v1784_v29 = vpop.f32.mrf.mxu3  ;;  %2551 = vmatmul.msk.f32.gmra.mxu0 %vm576_vm0, %v1788_v3  ;;  %2554 = vmatmul.msk.f32.gmra.mxu1 %vm576_vm0, %v1788_v3 }
 0x286   : > { %v1765_v10 = vadd.f32 %v1764_v33, %v1688_v47  ;;  %v1785_v34 = vadd.f32 %v1784_v29, %v1688_v47 }
 0x288   : > { %1884 = vmatpush.msra.mxu2 %v1765_v10  ;;  %1910 = vmatpush.msra.mxu3 %v1785_v34 }
 0x289   : > { %2556 = vmatmul.msk.f32.vlgmr.msra.gmra.mxu2 %vm576_vm0, %v1787_v14  ;;  %2559 = vmatmul.msk.f32.vlgmr.msra.gmra.mxu3 %vm576_vm0, %v1787_v14 }
 0x28a   : > { %2018 = vmatpush.msrb.mxu2 %v4077_v56  ;;  %2044 = vmatpush.msrb.mxu3 %v4081_v39 }
 0x28d   : > { %2552 = vmatmul.msk.f32.gmra.mxu0 %vm576_vm0, %v1789_v36  ;;  %2555 = vmatmul.msk.f32.gmra.mxu1 %vm576_vm0, %v1789_v36 }
 0x291   : > { %2557 = vmatmul.msk.f32.gmra.mxu2 %vm576_vm0, %v1788_v3  ;;  %2560 = vmatmul.msk.f32.gmra.mxu3 %vm576_vm0, %v1788_v3 }
 0x295   : > { %2562 = vmatmul.msk.f32.vlgmr.msrb.gmra.mxu0 %vm576_vm0, %v1921_v31  ;;  %2565 = vmatmul.msk.f32.vlgmr.msrb.gmra.mxu1 %vm576_vm0, %v1921_v31 }
 0x299   : > { %2558 = vmatmul.msk.f32.gmra.mxu2 %vm576_vm0, %v1789_v36  ;;  %2561 = vmatmul.msk.f32.gmra.mxu3 %vm576_vm0, %v1789_v36 }
 0x29d   : > { %2563 = vmatmul.msk.f32.gmra.mxu0 %vm576_vm0, %v1922_v23  ;;  %2566 = vmatmul.msk.f32.gmra.mxu1 %vm576_vm0, %v1922_v23 }
 0x2a1   : > { %2568 = vmatmul.msk.f32.vlgmr.msrb.gmra.mxu2 %vm576_vm0, %v1921_v31  ;;  %2571 = vmatmul.msk.f32.vlgmr.msrb.gmra.mxu3 %vm576_vm0, %v1921_v31 }
 0x2a5   : > { %2564 = vmatmul.msk.f32.gmra.mxu0 %vm576_vm0, %v1923_v12  ;;  %2567 = vmatmul.msk.f32.gmra.mxu1 %vm576_vm0, %v1923_v12 }
 0x2a9   : > { %2569 = vmatmul.msk.f32.gmra.mxu2 %vm576_vm0, %v1922_v23  ;;  %2572 = vmatmul.msk.f32.gmra.mxu3 %vm576_vm0, %v1922_v23 }
 0x2b1   : > { %2570 = vmatmul.msk.f32.gmra.mxu2 %vm576_vm0, %v1923_v12  ;;  %2573 = vmatmul.msk.f32.gmra.mxu3 %vm576_vm0, %v1923_v12  ;;  %v4134_v12 = vpop.permute.xlu0 %1939 }
 0x2fa   : > { %v1834_v49 = vpop.f32.mrf.mxu0  ;;  %v1860_v42 = vpop.f32.mrf.mxu1 }
 0x2fb   : > { %v1835_v18 = vadd.f32 %v1834_v49, %v1796_v9  ;;  %v1861_v13 = vadd.f32 %v1860_v42, %v1796_v9 }
 0x302   : > { %v1837_v59 = vpop.f32.mrf.mxu0  ;;  %v1863_v51 = vpop.f32.mrf.mxu1 }
 0x303   : > { %v1838_v21 = vadd.f32 %v1837_v59, %v1801_v1  ;;  %v1864_v2 = vadd.f32 %v1863_v51, %v1801_v1 }
 0x30a   : > { %v1840_v52 = vpop.f32.mrf.mxu0  ;;  %v1866_v30 = vpop.f32.mrf.mxu1 }
 0x30b   : > { %v4125_v25 = vadd.f32 %v1840_v52, %v4122_v54  ;;  %v4128_v43 = vadd.f32 %v1866_v30, %v4122_v54 }
 0x30c   : > { %v1886_v27 = vpop.f32.mrf.mxu2  ;;  %v1912_v37 = vpop.f32.mrf.mxu3 }
 0x30d   : > { %v1887_v0 = vadd.f32 %v1886_v27, %v1796_v9  ;;  %v1913_v40 = vadd.f32 %v1912_v37, %v1796_v9 }
 0x312   : > { %v1968_v61 = vpop.f32.mrf.mxu0  ;;  %v1994_v44 = vpop.f32.mrf.mxu1 }
 0x313   : > { %v1969_v6 = vadd.f32 %v1968_v61, %v1930_v17  ;;  %v1995_v7 = vadd.f32 %v1994_v44, %v1930_v17 }
 0x314   : > { %v1889_v48 = vpop.f32.mrf.mxu2  ;;  %v1915_v50 = vpop.f32.mrf.mxu3 }
 0x315   : > { %v2055_v26 = vadd.f32 %v1969_v6, %v1835_v18  ;;  %v2056_v11 = vadd.f32 %v1995_v7, %v1861_v13  ;;  %v1890_v10 = vadd.f32 %v1889_v48, %v1801_v1  ;;  %v1916_v34 = vadd.f32 %v1915_v50, %v1801_v1 }
 0x317   : > { %v2574_v28 = vmul.f32 -1.442695, %v2055_v26  ;;  %v2575_v53 = vmul.f32 -1.442695, %v2056_v11 }
 0x319   : > { %2634 = vpow2.f32 %v2574_v28 }
 0x31a   : > { %2636 = vpow2.f32 %v2575_v53  ;;  %v1971_v41 = vpop.f32.mrf.mxu0  ;;  %v1997_v57 = vpop.f32.mrf.mxu1 }
 0x31b   : > { %v1972_v62 = vadd.f32 %v1971_v41, %v4111_v60  ;;  %v1998_v55 = vadd.f32 %v1997_v57, %v4111_v60 }
 0x31c   : > { %v4115_v24 = vpop.f32.mrf.mxu2  ;;  %v4117_v8 = vpop.f32.mrf.mxu3 }
 0x31d   : > { %v2135_v45 = vadd.f32 %v1972_v62, %v1838_v21  ;;  %v2136_v58 = vadd.f32 %v1998_v55, %v1864_v2 }
 0x31f   : > { %v2635_v15 = vpop.eup %2634  ;;  %v2578_v20 = vmul.f32 -1.442695, %v2135_v45  ;;  %v2579_v5 = vmul.f32 -1.442695, %v2136_v58 }
 0x320   : > { %v2637_v16 = vpop.eup %2636  ;;  %v2071_v35 = vadd.f32 1.0, %v2635_v15 }
 0x321   : > { %v4119_v63 = vadd.f32 1.0, %v2637_v16  ;;  %2638 = vpow2.f32 %v2578_v20 }
 0x322   : > { %2640 = vrcp.f32 %v2071_v35  ;;  %v1974_v14 = vpop.f32.mrf.mxu0  ;;  %v2084_v31 = vand.u32 2147483647, %v2071_v35  ;;  %vm2080_vm5 = vweird.f32 %v2071_v35  ;;  %v2086_v42 = vand.u32 2147483648, %v2071_v35  ;;  %v2000_v59 = vpop.f32.mrf.mxu1 }
 0x323   : > { %2642 = vrcp.f32 %v4119_v63  ;;  %v1975_v30 = vadd.f32 %v1974_v14, %v4134_v12  ;;  %v2099_v27 = vand.u32 2147483647, %v4119_v63  ;;  %v2101_v44 = vand.u32 2147483648, %v4119_v63 }
 0x324   : > { %2644 = vpow2.f32 %v2579_v5  ;;  %v2020_v22 = vpop.f32.mrf.mxu2  ;;  %v2046_v32 = vpop.f32.mrf.mxu3  ;;  %vm4144_vm6 = vcmp.eq.f32.partialorder %v2084_v31, 8.507059e+37  ;;  %v2001_v13 = vadd.f32 %v2000_v59, %v4134_v12  ;;  %vm2095_vm7 = vweird.f32 %v4119_v63 }
 0x325   : > { %v2021_v19 = vadd.f32 %v2020_v22, %v1930_v17  ;;  %v2047_v47 = vadd.f32 %v2046_v32, %v1930_v17  ;;  %v2087_v50 = vor.u32 1.1754944e-38, %v2086_v42  ;;  %vm4153_vm9 = vcmp.eq.f32.partialorder %v2099_v27, 8.507059e+37 }
 0x326   : > { %v2102_v41 = vor.u32 1.1754944e-38, %v2101_v44 }
 0x327   : > { %v2639_v46 = vpop.eup %2638  ;;  %v2057_v3 = vadd.f32 %v2021_v19, %v1887_v0  ;;  %v2058_v33 = vadd.f32 %v2047_v47, %v1913_v40 }
 0x328   : > { %v2641_v29 = vpop.eup %2640  ;;  %v4130_v36 = vadd.f32 1.0, %v2639_v46 }
 0x329   : > { %v4132_v23 = vpop.eup %2642  ;;  %v2076_v49 = vmul.f32 %v2641_v29, %v2071_v35  ;;  %v2576_v51 = vmul.f32 -1.442695, %v2057_v3  ;;  %v2577_v37 = vmul.f32 -1.442695, %v2058_v33  ;;  %vm2081_vm8 = vweird.f32 %v2641_v29 }
 0x32a   : > { %v2645_v52 = vpop.eup %2644  ;;  %2646 = vrcp.f32 %v4130_v36  ;;  %v2091_v61 = vmul.f32 %v4132_v23, %v4119_v63  ;;  %v2166_v26 = vand.u32 2147483648, %v4130_v36  ;;  %vm2160_vm10 = vweird.f32 %v4130_v36  ;;  %vm2082_vm11 = vmor %vm2080_vm5, %vm2081_vm8 }
 0x32b   : > { %v4139_v9 = vadd.f32 1.0, %v2645_v52  ;;  %v2077_v17 = vsub.f32 1.0, %v2076_v49  ;;  %2648 = vpow2.f32 %v2576_v51  ;;  %vm2096_vm12 = vweird.f32 %v4132_v23 }
 0x32c   : > { %v2023_v6 = vpop.f32.mrf.mxu2  ;;  %v2049_v7 = vpop.f32.mrf.mxu3  ;;  %v2092_v11 = vsub.f32 1.0, %v2091_v61  ;;  %v2164_v58 = vand.u32 2147483647, %v4130_v36  ;;  %v2167_v16 = vor.u32 1.1754944e-38, %v2166_v26  ;;  %vm2097_vm13 = vmor %vm2095_vm7, %vm2096_vm12 }
 0x32d   : > { %2650 = vrcp.f32 %v4139_v9  ;;  %v2078_v48 = vmul.f32 %v2641_v29, %v2077_v17  ;;  %v2024_v28 = vadd.f32 %v2023_v6, %v4111_v60  ;;  %v2050_v57 = vadd.f32 %v2049_v7, %v4111_v60 }
 0x32e   : > { %2652 = vpow2.f32 %v2577_v37  ;;  %v2093_v2 = vmul.f32 %v4132_v23, %v2092_v11  ;;  %v2181_v31 = vand.u32 2147483648, %v4139_v9  ;;  %vm2165_vm1 = vcmp.eq.f32.partialorder %v2164_v58, 8.507059e+37 }
 0x32f   : > { %v2079_v53 = vadd.f32 %v2641_v29, %v2078_v48  ;;  %v2137_v62 = vadd.f32 %v2024_v28, %v1890_v10  ;;  %v2138_v15 = vadd.f32 %v2050_v57, %v1916_v34  ;;  %vm2175_vm2 = vweird.f32 %v4139_v9 }
 0x330   : > { %v2647_v21 = vpop.eup %2646  ;;  %v2094_v5 = vadd.f32 %v4132_v23, %v2093_v2  ;;  %v2182_v37 = vor.u32 1.1754944e-38, %v2181_v31  ;;  %v1893_v28 = vadd.f32 %v4115_v24, %v4122_v54  ;;  %v1919_v31 = vadd.f32 %v4117_v8, %v4122_v54 }
 0x331   : > { %v2156_v55 = vmul.f32 %v2647_v21, %v4130_v36  ;;  %v2083_v45 = vsel %vm2082_vm11, %v2641_v29, %v2079_v53  ;;  %v2649_v20 = vpop.eup %2648  ;;  %v2580_v35 = vmul.f32 -1.442695, %v2137_v62  ;;  %v2581_v19 = vmul.f32 -1.442695, %v2138_v15 }
 0x332   : > { %v2088_v60 = vsel %vm4144_vm6, %v2087_v50, %v2083_v45  ;;  %v4169_v40 = vadd.f32 1.0, %v2649_v20  ;;  %vm2161_vm14 = vweird.f32 %v2647_v21  ;;  %v2098_v14 = vsel %vm2097_vm13, %v4132_v23, %v2094_v5 }
 0x333   : > { %v2651_v22 = vpop.eup %2650  ;;  %v2157_v32 = vsub.f32 1.0, %v2156_v55  ;;  %v2215_v0 = vmul.f32 %v2088_v60, %v1975_v30  ;;  %2654 = vpow2.f32 %v2580_v35  ;;  %v2103_v29 = vsel %vm4153_vm9, %v2102_v41, %v2098_v14  ;;  %vm2162_vm15 = vmor %vm2160_vm10, %vm2161_vm14 }
 0x334   : > { %v2653_v47 = vpop.eup %2652  ;;  %v2171_v46 = vmul.f32 %v2651_v22, %v4139_v9  ;;  %2656 = vrcp.f32 %v4169_v40  ;;  %v2216_v10 = vmul.f32 %v2103_v29, %v2001_v13  ;;  %v2179_v23 = vand.u32 2147483647, %v4139_v9  ;;  %v2026_v44 = vpop.f32.mrf.mxu2 }
 0x335   : > { %v2158_v3 = vmul.f32 %v2647_v21, %v2157_v32  ;;  %v2219_v33 = vadd.f32 %v2215_v0, %v4125_v25  ;;  %v4177_v34 = vadd.f32 1.0, %v2653_v47  ;;  %2658 = vpow2.f32 %v2581_v19  ;;  %v2052_v11 = vpop.f32.mrf.mxu3 }
 0x336   : > { %v2172_v63 = vsub.f32 1.0, %v2171_v46  ;;  %vm2176_vm0 = vweird.f32 %v2651_v22  ;;  %v2220_v42 = vadd.f32 %v2216_v10, %v4128_v43  ;;  %vm2180_vm4 = vcmp.eq.f32.partialorder %v2179_v23, 8.507059e+37 }
 0x337   : > { %v2159_v49 = vadd.f32 %v2647_v21, %v2158_v3  ;;  %2660 = vtanh.f32 %v2219_v33  ;;  %vm2177_vm3 = vmor %vm2175_vm2, %vm2176_vm0  ;;  %v2116_v26 = vand.u32 2147483648, %v4169_v40  ;;  %v2027_v53 = vadd.f32 %v2026_v44, %v4134_v12 }
 0x338   : > { %v2173_v25 = vmul.f32 %v2651_v22, %v2172_v63  ;;  %2662 = vrcp.f32 %v4177_v34  ;;  %vm2110_vm5 = vweird.f32 %v4169_v40  ;;  %v2053_v55 = vadd.f32 %v2052_v11, %v4134_v12 }
 0x339   : > { %v2163_v59 = vsel %vm2162_vm15, %v2647_v21, %v2159_v49  ;;  %v2655_v51 = vpop.eup %2654  ;;  %2664 = vtanh.f32 %v2220_v42  ;;  %v2114_v21 = vand.u32 2147483647, %v4169_v40  ;;  %v2117_v58 = vor.u32 1.1754944e-38, %v2116_v26 }
 0x33a   : > { %v2168_v52 = vsel %vm2165_vm1, %v2167_v16, %v2163_v59  ;;  %v2174_v30 = vadd.f32 %v2651_v22, %v2173_v25  ;;  %v2657_v27 = vpop.eup %2656  ;;  %v4187_v17 = vadd.f32 1.0, %v2655_v51  ;;  %v2129_v15 = vand.u32 2147483647, %v4177_v34 }
 0x33b   : > { %v2659_v36 = vpop.eup %2658  ;;  %v2106_v43 = vmul.f32 %v2657_v27, %v4169_v40  ;;  %v2227_v13 = vsub.f32 1.0, %v2168_v52  ;;  %vm2111_vm6 = vweird.f32 %v2657_v27  ;;  %v2131_v20 = vand.u32 2147483648, %v4177_v34 }
 0x33c   : > { %v2178_v61 = vsel %vm2177_vm3, %v2651_v22, %v2174_v30  ;;  %2666 = vrcp.f32 %v4187_v17  ;;  %v4191_v48 = vadd.f32 1.0, %v2659_v36  ;;  %vm2112_vm7 = vmor %vm2110_vm5, %vm2111_vm6  ;;  %v2235_v5 = vmul.f32 %v4059_v38, %v2168_v52 }
 0x33d   : > { %v2661_v18 = vpop.eup %2660  ;;  %v2183_v6 = vsel %vm2180_vm4, %v2182_v37, %v2178_v61  ;;  %v2107_v50 = vsub.f32 1.0, %v2106_v43  ;;  %vm2115_vm9 = vcmp.eq.f32.partialorder %v2114_v21, 8.507059e+37  ;;  %vm2125_vm10 = vweird.f32 %v4177_v34 }
 0x33e   : > { %v2663_v9 = vpop.eup %2662  ;;  %v2228_v7 = vsub.f32 1.0, %v2183_v6  ;;  %2668 = vrcp.f32 %v4191_v48  ;;  %v2231_v2 = vmul.f32 %v2661_v18, %v2227_v13  ;;  %v2236_v35 = vmul.f32 %v4063_v4, %v2183_v6 }
 0x33f   : > { %v2121_v1 = vmul.f32 %v2663_v9, %v4177_v34  ;;  %v2665_v41 = vpop.eup %2664  ;;  %v2108_v57 = vmul.f32 %v2657_v27, %v2107_v50  ;;  %vm2126_vm8 = vweird.f32 %v2663_v9  ;;  %v2196_v40 = vand.u32 2147483648, %v4187_v17 }
 0x340   : > { %v2232_v62 = vmul.f32 %v2665_v41, %v2228_v7  ;;  %v2239_v19 = vadd.f32 %v2235_v5, %v2231_v2  ;;  %vm2127_vm11 = vmor %vm2125_vm10, %vm2126_vm8  ;;  %v2132_v38 = vor.u32 1.1754944e-38, %v2131_v20  ;;  %v2194_v33 = vand.u32 2147483647, %v4187_v17 }
 0x341   : > { %v2122_v45 = vsub.f32 1.0, %v2121_v1  ;;  %v2109_v24 = vadd.f32 %v2657_v27, %v2108_v57  ;;  %vm2130_vm12 = vcmp.eq.f32.partialorder %v2129_v15, 8.507059e+37  ;;  %vm2190_vm14 = vweird.f32 %v4187_v17 }
 0x342   : > { %v2667_v16 = vpop.eup %2666  ;;  %v2240_v47 = vadd.f32 %v2236_v35, %v2232_v62  ;;  %2243 = vst [vmem:[%s4215_s14] sm:$0xff] %v2239_v19  ;;  %v2197_v25 = vor.u32 1.1754944e-38, %v2196_v40  ;;  %v2211_v42 = vand.u32 2147483648, %v4191_v48  ;;  %v2209_v52 = vand.u32 2147483647, %v4191_v48 }
 0x343   : > { %v2123_v60 = vmul.f32 %v2663_v9, %v2122_v45  ;;  %v2186_v12 = vmul.f32 %v2667_v16, %v4187_v17  ;;  %v2113_v22 = vsel %vm2112_vm7, %v2657_v27, %v2109_v24  ;;  %vm2191_vm13 = vweird.f32 %v2667_v16 }
 0x344   : > { %v2118_v32 = vsel %vm2115_vm9, %v2117_v58, %v2113_v22  ;;  %v2669_v46 = vpop.eup %2668  ;;  %2244 = vst [vmem:[%s4215_s14 + $0x8] sm:$0xff] %v2240_v47  ;;  %vm2192_vm15 = vmor %vm2190_vm14, %vm2191_vm13  ;;  %vm2195_vm1 = vcmp.eq.f32.partialorder %v2194_v33, 8.507059e+37  ;;  %vm2205_vm2 = vweird.f32 %v4191_v48  ;;  %v2212_v37 = vor.u32 1.1754944e-38, %v2211_v42 }
 0x345   : > { %v2124_v0 = vadd.f32 %v2663_v9, %v2123_v60  ;;  %v2187_v14 = vsub.f32 1.0, %v2186_v12  ;;  %v2217_v3 = vmul.f32 %v2118_v32, %v2027_v53  ;;  %v2201_v4 = vmul.f32 %v2669_v46, %v4191_v48 }
 0x346   : > { %vm2206_vm0 = vweird.f32 %v2669_v46  ;;  %vm2210_vm4 = vcmp.eq.f32.partialorder %v2209_v52, 8.507059e+37 }
 0x347   : > { %v2128_v29 = vsel %vm2127_vm11, %v2663_v9, %v2124_v0  ;;  %v2188_v63 = vmul.f32 %v2667_v16, %v2187_v14  ;;  %v2221_v10 = vadd.f32 %v2217_v3, %v1893_v28  ;;  %v2202_v49 = vsub.f32 1.0, %v2201_v4  ;;  %vm2207_vm3 = vmor %vm2205_vm2, %vm2206_vm0 }
 0x348   : > { %v2133_v34 = vsel %vm2130_vm12, %v2132_v38, %v2128_v29 }
 0x349   : > { %v2218_v23 = vmul.f32 %v2133_v34, %v2053_v55  ;;  %v2189_v59 = vadd.f32 %v2667_v16, %v2188_v63  ;;  %2670 = vtanh.f32 %v2221_v10  ;;  %v2203_v51 = vmul.f32 %v2669_v46, %v2202_v49 }
 0x34b   : > { %v2222_v30 = vadd.f32 %v2218_v23, %v1919_v31  ;;  %v2193_v27 = vsel %vm2192_vm15, %v2667_v16, %v2189_v59  ;;  %v2204_v54 = vadd.f32 %v2669_v46, %v2203_v51 }
 0x34c   : > { %v2198_v8 = vsel %vm2195_vm1, %v2197_v25, %v2193_v27 }
 0x34d   : > { %2672 = vtanh.f32 %v2222_v30  ;;  %v2229_v17 = vsub.f32 1.0, %v2198_v8  ;;  %v2208_v36 = vsel %vm2207_vm3, %v2669_v46, %v2204_v54  ;;  %v2237_v13 = vmul.f32 %v4077_v56, %v2198_v8 }
 0x34e   : > { %v2213_v44 = vsel %vm2210_vm4, %v2212_v37, %v2208_v36 }
 0x34f   : > { %v2671_v61 = vpop.eup %2670  ;;  %v2230_v18 = vsub.f32 1.0, %v2213_v44  ;;  %v2238_v48 = vmul.f32 %v4081_v39, %v2213_v44 }
 0x350   : > { %v2233_v43 = vmul.f32 %v2671_v61, %v2229_v17 }
 0x352   : > { %v2241_v9 = vadd.f32 %v2237_v13, %v2233_v43 }
 0x353   : > { %v2673_v6 = vpop.eup %2672 }
 0x354   : > { %v2234_v7 = vmul.f32 %v2673_v6, %v2230_v18  ;;  %2245 = vst [vmem:[%s4215_s14 + $0x10] sm:$0xff] %v2241_v9 }
 0x356   : > { %v2242_v50 = vadd.f32 %v2238_v48, %v2234_v7 }
 0x358   : > { %2246 = vst [vmem:[%s4215_s14 + $0x18] sm:$0xff] %v2242_v50 }
 0x359   : > { %2705 = shalt.err (!%p2702_p7)
}
 0x35a   : > { %2591 = dma.vmem_to_hbm [thread:$0]  (%p2842_p6), %s2262_s21, 512, %s2264_s13, %s2248_s29  }
 0x35b PF: > { %s2275_s24 = sand.u32 1, %s2728_s17   ;;  %p2594_p10 = pnand %p2343_p9, %p2846_p8 }
 0x35c   : > { %s2276_s14 = scalar_lea.sflag [#allocation4], %s2275_s24 }
 0x35d   : > { %p2595_p11 = pneg %p2594_p10 }
 0x35f   : > { %2723 = dma.done.wait (%p2595_p11), %s2276_s14, 512  }
 0x360   : > { %2725 = vsyncadd (%p2595_p11), %s2276_s14, 4294966784  ;;  %p21_p12 = scmp.ge.s32.totalorder %s2828_s23, 4   ;;  %s4409_s17 = smov %s2732_s18 }
 0x361   : > { %s4410_s18 = smov %s2736_s19  ;;  %s4411_s19 = smov %s2840_s26 }
 0x362   : > { %s4412_s20 = smov %s2828_s23  ;;  %23 = sbr.rel (!%p21_p12) target bundleno = 5 (0x5), region = 133 }
 0x367   :  { %2282 = vsyncpa [#allocation4], 1 }
 0x368   :  { %2284 = vsyncpa [#allocation4 + $0x1], 1 }

</bundles_post_ra>
